<compile_context>
chip_gen: v5e
topology: v5e:2x2
jax: 0.10.0
libtpu: 0.0.40
codegen_flags: <defaults>
</compile_context>

<pallas_src>
import jax
import jax.numpy as jnp
from jax.experimental import pallas as pl
from jax.experimental.pallas import tpu as pltpu


def snn_kernel(ids_ref, table_t_ref, w1a_ref, w1b_ref, b1_ref, w2_ref, b2_ref,
               out_ref):
    emb_dim, v_pad = table_t_ref.shape        # [E, V_pad] (resident, transposed)
    n_tok = ids_ref.shape[-1]                 # 2 * L * TB token ids, lane-major
    tb = out_ref.shape[-1]                    # batch tile (lane axis)
    seq_len = n_tok // (2 * tb)               # L

    # ---- fused embedding lookup: one big one-hot matmul on the MXU ---------
    ids_row = ids_ref[0]                                              # [1, N]
    v_iota = jax.lax.broadcasted_iota(jnp.int32, (v_pad, n_tok), 0)   # [V, N]
    one_hot_t = (v_iota == ids_row).astype(jnp.float32)               # [V, N]
    # emb_T[:, c] = embedding of token c  (columns: src-major, l, batch-minor)
    emb_t = jnp.dot(table_t_ref[...], one_hot_t,
                    preferred_element_type=jnp.float32)               # [E, N]

    # ---- max-pool over the sequence axis (torch.max(emb(x), 1).values) -----
    def max_pool(base):
        acc = emb_t[:, base:base + tb]                                # [E, TB]
        for l in range(1, seq_len):
            acc = jnp.maximum(acc,
                              emb_t[:, base + l * tb: base + (l + 1) * tb])
        return acc                                                    # [E, TB]

    pre_t = max_pool(0)                  # premise  max-pool, transposed
    hyp_t = max_pool(seq_len * tb)       # hypothesis max-pool, transposed

    # ---- ff_layer: (cat @ W1^T + b1) computed transposed -------------------
    # (W1 @ cat^T) == W1[:, :E] @ pre^T + W1[:, E:] @ hyp^T  -> no lane concat
    h_t = (jnp.dot(w1a_ref[...], pre_t, preferred_element_type=jnp.float32)
           + jnp.dot(w1b_ref[...], hyp_t, preferred_element_type=jnp.float32)
           + b1_ref[...])                                             # [H, TB]
    h_t = jnp.maximum(h_t, 0.0)                                       # ReLU

    # ---- layer_pred + sigmoid: logits come out lane-packed [1, TB] ---------
    logit = jnp.dot(w2_ref[...], h_t,
                    preferred_element_type=jnp.float32) + b2_ref[0]   # [1, TB]
    out_ref[0] = jax.nn.sigmoid(logit)                                # lane-dense


def shallow_nn_forward(premise, hypothesis, emb_table, w1, b1, w2, b2,
                       *, batch_tile=512):
    """premise, hypothesis: [B, L] int32 token ids (all ids < VOCAB).

    emb_table: [VOCAB, E]   (nn.Embedding.weight)
    w1:        [H, 2E]      (ff_layer.weight, torch layout)
    b1:        [H]          (ff_layer.bias)
    w2:        [1, H]       (layer_pred.weight, torch layout)
    b2:        [1]          (layer_pred.bias)
    Returns [B] f32 probabilities.
    """
    B, L = premise.shape
    VOCAB, E = emb_table.shape
    H = w1.shape[0]
    LANE = 128

    # Batch tile: batch sits on the lane axis in-kernel, so keep it a multiple
    # of 128.  With the default cap of 512, B > 512 yields >=2 parallel grid
    # steps (both v7x TensorCores busy); small B collapses to a single step.
    tile_cap = max(LANE, ((batch_tile + LANE - 1) // LANE) * LANE)
    TB = min(tile_cap, ((B + LANE - 1) // LANE) * LANE)
    B_pad = ((B + TB - 1) // TB) * TB
    G = B_pad // TB
    if B_pad != B:
        premise = jnp.pad(premise, ((0, B_pad - B), (0, 0)))
        hypothesis = jnp.pad(hypothesis, ((0, B_pad - B), (0, 0)))

    # Vocab padded to a lane-dense multiple of 128; padded rows are zero and
    # are never selected (ids < VOCAB), so they contribute exact zeros.
    V_pad = ((VOCAB + LANE - 1) // LANE) * LANE
    table_t = emb_table.T                                       # [E, VOCAB]
    if V_pad != VOCAB:
        table_t = jnp.pad(table_t, ((0, 0), (0, V_pad - VOCAB)))

    # Lane-major id layout per block: column c = src*(L*TB) + l*TB + b.
    N_tok = 2 * L * TB
    ids = jnp.stack([premise, hypothesis], axis=0)              # [2, B_pad, L]
    ids = ids.reshape(2, G, TB, L).transpose(1, 0, 3, 2)        # [G, 2, L, TB]
    ids = ids.reshape(G, 1, N_tok).astype(jnp.int32)

    w1a = w1[:, :E]                                             # [H, E]
    w1b = w1[:, E:]                                             # [H, E]
    b1_col = b1.reshape(H, 1).astype(jnp.float32)
    w2_row = w2.reshape(1, H).astype(jnp.float32)
    b2_1d = b2.reshape(1).astype(jnp.float32)

    out = pl.pallas_call(
        snn_kernel,
        out_shape=jax.ShapeDtypeStruct((G, 1, TB), jnp.float32),
        grid=(G,),
        in_specs=[
            pl.BlockSpec((1, 1, N_tok), lambda i: (i, 0, 0)),     # token ids
            pl.BlockSpec((E, V_pad), lambda i: (0, 0)),           # emb table^T (resident)
            pl.BlockSpec((H, E), lambda i: (0, 0)),               # W1[:, :E]
            pl.BlockSpec((H, E), lambda i: (0, 0)),               # W1[:, E:]
            pl.BlockSpec((H, 1), lambda i: (0, 0)),               # b1 column
            pl.BlockSpec((1, H), lambda i: (0, 0)),               # layer_pred weight row
            pl.BlockSpec(memory_space=pltpu.MemorySpace.SMEM),    # layer_pred bias (scalar)
        ],
        out_specs=pl.BlockSpec((1, 1, TB), lambda i: (i, 0, 0)),
        compiler_params=pltpu.CompilerParams(
            dimension_semantics=("parallel",),
            vmem_limit_bytes=32 * 1024 * 1024,
        ),
    )(ids, table_t, w1a, w1b, b1_col, w2_row, b2_1d)

    return out.reshape(B_pad)[:B]                                # .squeeze(1)


if __name__ == "__main__":
    # Small shapes consistent with the module.
    VOCAB = 50
    EMB_DIM = 32        # embedding.embedding_dim
    HIDDEN = 32         # hidden_size
    B = 16              # batch
    L = 8               # sequence length

    key = jax.random.PRNGKey(0)
    k_emb, k_w1, k_b1, k_w2, k_b2, k_p, k_h = jax.random.split(key, 7)

    # Deterministic parameter init (torch parameter layouts).
    emb_table = jax.random.normal(k_emb, (VOCAB, EMB_DIM), jnp.float32)

    lim1 = 1.0 / jnp.sqrt(2.0 * EMB_DIM)
    w1 = jax.random.uniform(k_w1, (HIDDEN, 2 * EMB_DIM), jnp.float32, -lim1, lim1)
    b1 = jax.random.uniform(k_b1, (HIDDEN,), jnp.float32, -lim1, lim1)

    lim2 = 1.0 / jnp.sqrt(float(HIDDEN))
    w2 = jax.random.uniform(k_w2, (1, HIDDEN), jnp.float32, -lim2, lim2)
    b2 = jax.random.uniform(k_b2, (1,), jnp.float32, -lim2, lim2)

    premise = jax.random.randint(k_p, (B, L), 0, VOCAB, jnp.int32)
    hypothesis = jax.random.randint(k_h, (B, L), 0, VOCAB, jnp.int32)

    out = shallow_nn_forward(premise, hypothesis, emb_table, w1, b1, w2, b2)
    out = jax.block_until_ready(out)
    assert out.shape == (B,)

    # Pure-JAX reference of the same math (torch semantics).
    pre_emb = jnp.take(emb_table, premise, axis=0).max(axis=1)
    hyp_emb = jnp.take(emb_table, hypothesis, axis=0).max(axis=1)
    cat = jnp.concatenate([pre_emb, hyp_emb], axis=1)
    hidden = jnp.maximum(cat @ w1.T + b1, 0.0)
    ref = jax.nn.sigmoid(hidden @ w2.T + b2)[:, 0]
    assert jnp.allclose(out, ref, atol=1e-5), (out, ref)

    print("KERNEL_OK")
</pallas_src>

<mosaic_0001>
module attributes {stable_mosaic.version = 11 : i64} {
  func.func @snn_kernel(%arg0: i32, %arg1: memref<1x1x2048xi32, #tpu.memory_space<vmem>>, %arg2: memref<32x128xf32, #tpu.memory_space<vmem>>, %arg3: memref<32x32xf32, #tpu.memory_space<vmem>>, %arg4: memref<32x32xf32, #tpu.memory_space<vmem>>, %arg5: memref<32x1xf32, #tpu.memory_space<vmem>>, %arg6: memref<1x32xf32, #tpu.memory_space<vmem>>, %arg7: memref<1xf32, #tpu.memory_space<smem>>, %arg8: memref<1x1x128xf32, #tpu.memory_space<vmem>>) attributes {dimension_semantics = [#tpu.dimension_semantics<parallel>], iteration_bounds = array<i64: 1>, scalar_prefetch = 0 : i64, scratch_operands = 0 : i64, tpu.core_type = #tpu.core_type<tc>, window_params = [{transform_indices = @transform_0, window_bounds = array<i64: 1, 1, 2048>}, {pipeline_mode = #tpu.pipeline_mode<synchronous>, transform_indices = @transform_1, window_bounds = array<i64: 32, 128>}, {pipeline_mode = #tpu.pipeline_mode<synchronous>, transform_indices = @transform_2, window_bounds = array<i64: 32, 32>}, {pipeline_mode = #tpu.pipeline_mode<synchronous>, transform_indices = @transform_3, window_bounds = array<i64: 32, 32>}, {pipeline_mode = #tpu.pipeline_mode<synchronous>, transform_indices = @transform_4, window_bounds = array<i64: 32, 1>}, {pipeline_mode = #tpu.pipeline_mode<synchronous>, transform_indices = @transform_5, window_bounds = array<i64: 1, 32>}, {transform_indices = @transform_6, window_bounds = array<i64: 1>}, {transform_indices = @transform_7, window_bounds = array<i64: 1, 1, 128>}]} {
    %c0 = arith.constant 0 : index
    %c0_0 = arith.constant 0 : index
    %c0_1 = arith.constant 0 : index
    %0 = vector.load %arg1[%c0, %c0_0, %c0_1] : memref<1x1x2048xi32, #tpu.memory_space<vmem>>, vector<1x1x2048xi32>
    %1 = vector.shape_cast %0 : vector<1x1x2048xi32> to vector<1x2048xi32>
    %2 = tpu.iota {dimensions = array<i32: 0>} : vector<128x2048xi32>
    %3 = vector.broadcast %1 : vector<1x2048xi32> to vector<128x2048xi32>
    %4 = arith.cmpi eq, %2, %3 : vector<128x2048xi32>
    %5 = arith.extui %4 : vector<128x2048xi1> to vector<128x2048xi32>
    %6 = arith.sitofp %5 : vector<128x2048xi32> to vector<128x2048xf32>
    %c0_2 = arith.constant 0 : index
    %c0_3 = arith.constant 0 : index
    %7 = vector.load %arg2[%c0_2, %c0_3] : memref<32x128xf32, #tpu.memory_space<vmem>>, vector<32x128xf32>
    %cst = arith.constant dense<0.000000e+00> : vector<32x2048xf32>
    %8 = tpu.matmul %7, %6, %cst {dimension_numbers = #tpu.dot_dimension_numbers<[1], [0], [0], [1], [0, 0, 1, 1], [], []>} : vector<32x128xf32>, vector<128x2048xf32>, vector<32x2048xf32> -> vector<32x2048xf32>
    %9 = vector.extract_strided_slice %8 {offsets = [0, 0], sizes = [32, 128], strides = [1, 1]} : vector<32x2048xf32> to vector<32x128xf32>
    %10 = vector.extract_strided_slice %8 {offsets = [0, 128], sizes = [32, 128], strides = [1, 1]} : vector<32x2048xf32> to vector<32x128xf32>
    %11 = arith.maximumf %9, %10 : vector<32x128xf32>
    %12 = vector.extract_strided_slice %8 {offsets = [0, 256], sizes = [32, 128], strides = [1, 1]} : vector<32x2048xf32> to vector<32x128xf32>
    %13 = arith.maximumf %11, %12 : vector<32x128xf32>
    %14 = vector.extract_strided_slice %8 {offsets = [0, 384], sizes = [32, 128], strides = [1, 1]} : vector<32x2048xf32> to vector<32x128xf32>
    %15 = arith.maximumf %13, %14 : vector<32x128xf32>
    %16 = vector.extract_strided_slice %8 {offsets = [0, 512], sizes = [32, 128], strides = [1, 1]} : vector<32x2048xf32> to vector<32x128xf32>
    %17 = arith.maximumf %15, %16 : vector<32x128xf32>
    %18 = vector.extract_strided_slice %8 {offsets = [0, 640], sizes = [32, 128], strides = [1, 1]} : vector<32x2048xf32> to vector<32x128xf32>
    %19 = arith.maximumf %17, %18 : vector<32x128xf32>
    %20 = vector.extract_strided_slice %8 {offsets = [0, 768], sizes = [32, 128], strides = [1, 1]} : vector<32x2048xf32> to vector<32x128xf32>
    %21 = arith.maximumf %19, %20 : vector<32x128xf32>
    %22 = vector.extract_strided_slice %8 {offsets = [0, 896], sizes = [32, 128], strides = [1, 1]} : vector<32x2048xf32> to vector<32x128xf32>
    %23 = arith.maximumf %21, %22 : vector<32x128xf32>
    %24 = vector.extract_strided_slice %8 {offsets = [0, 1024], sizes = [32, 128], strides = [1, 1]} : vector<32x2048xf32> to vector<32x128xf32>
    %25 = vector.extract_strided_slice %8 {offsets = [0, 1152], sizes = [32, 128], strides = [1, 1]} : vector<32x2048xf32> to vector<32x128xf32>
    %26 = arith.maximumf %24, %25 : vector<32x128xf32>
    %27 = vector.extract_strided_slice %8 {offsets = [0, 1280], sizes = [32, 128], strides = [1, 1]} : vector<32x2048xf32> to vector<32x128xf32>
    %28 = arith.maximumf %26, %27 : vector<32x128xf32>
    %29 = vector.extract_strided_slice %8 {offsets = [0, 1408], sizes = [32, 128], strides = [1, 1]} : vector<32x2048xf32> to vector<32x128xf32>
    %30 = arith.maximumf %28, %29 : vector<32x128xf32>
    %31 = vector.extract_strided_slice %8 {offsets = [0, 1536], sizes = [32, 128], strides = [1, 1]} : vector<32x2048xf32> to vector<32x128xf32>
    %32 = arith.maximumf %30, %31 : vector<32x128xf32>
    %33 = vector.extract_strided_slice %8 {offsets = [0, 1664], sizes = [32, 128], strides = [1, 1]} : vector<32x2048xf32> to vector<32x128xf32>
    %34 = arith.maximumf %32, %33 : vector<32x128xf32>
    %35 = vector.extract_strided_slice %8 {offsets = [0, 1792], sizes = [32, 128], strides = [1, 1]} : vector<32x2048xf32> to vector<32x128xf32>
    %36 = arith.maximumf %34, %35 : vector<32x128xf32>
    %37 = vector.extract_strided_slice %8 {offsets = [0, 1920], sizes = [32, 128], strides = [1, 1]} : vector<32x2048xf32> to vector<32x128xf32>
    %38 = arith.maximumf %36, %37 : vector<32x128xf32>
    %c0_4 = arith.constant 0 : index
    %c0_5 = arith.constant 0 : index
    %39 = vector.load %arg3[%c0_4, %c0_5] : memref<32x32xf32, #tpu.memory_space<vmem>>, vector<32x32xf32>
    %cst_6 = arith.constant dense<0.000000e+00> : vector<32x128xf32>
    %40 = tpu.matmul %39, %23, %cst_6 {dimension_numbers = #tpu.dot_dimension_numbers<[1], [0], [0], [1], [0, 0, 1, 1], [], []>} : vector<32x32xf32>, vector<32x128xf32>, vector<32x128xf32> -> vector<32x128xf32>
    %c0_7 = arith.constant 0 : index
    %c0_8 = arith.constant 0 : index
    %41 = vector.load %arg4[%c0_7, %c0_8] : memref<32x32xf32, #tpu.memory_space<vmem>>, vector<32x32xf32>
    %cst_9 = arith.constant dense<0.000000e+00> : vector<32x128xf32>
    %42 = tpu.matmul %41, %38, %cst_9 {dimension_numbers = #tpu.dot_dimension_numbers<[1], [0], [0], [1], [0, 0, 1, 1], [], []>} : vector<32x32xf32>, vector<32x128xf32>, vector<32x128xf32> -> vector<32x128xf32>
    %43 = arith.addf %40, %42 : vector<32x128xf32>
    %c0_10 = arith.constant 0 : index
    %c0_11 = arith.constant 0 : index
    %44 = vector.load %arg5[%c0_10, %c0_11] : memref<32x1xf32, #tpu.memory_space<vmem>>, vector<32x1xf32>
    %45 = vector.broadcast %44 : vector<32x1xf32> to vector<32x128xf32>
    %46 = arith.addf %43, %45 : vector<32x128xf32>
    %cst_12 = arith.constant 0.000000e+00 : f32
    %47 = vector.broadcast %cst_12 : f32 to vector<32x128xf32>
    %48 = arith.maximumf %46, %47 : vector<32x128xf32>
    %c0_13 = arith.constant 0 : index
    %c0_14 = arith.constant 0 : index
    %49 = vector.load %arg6[%c0_13, %c0_14] : memref<1x32xf32, #tpu.memory_space<vmem>>, vector<1x32xf32>
    %cst_15 = arith.constant dense<0.000000e+00> : vector<1x128xf32>
    %50 = tpu.matmul %49, %48, %cst_15 {dimension_numbers = #tpu.dot_dimension_numbers<[1], [0], [0], [1], [0, 0, 1, 1], [], []>} : vector<1x32xf32>, vector<32x128xf32>, vector<1x128xf32> -> vector<1x128xf32>
    %c0_16 = arith.constant 0 : index
    %51 = memref.load %arg7[%c0_16] : memref<1xf32, #tpu.memory_space<smem>>
    %52 = vector.broadcast %51 : f32 to vector<1x128xf32>
    %53 = arith.addf %50, %52 : vector<1x128xf32>
    %54 = arith.negf %53 : vector<1x128xf32>
    %55 = math.exp %54 : vector<1x128xf32>
    %cst_17 = arith.constant 1.000000e+00 : f32
    %56 = vector.broadcast %cst_17 : f32 to vector<1x128xf32>
    %57 = arith.addf %56, %55 : vector<1x128xf32>
    %58 = arith.divf %56, %57 : vector<1x128xf32>
    %c0_18 = arith.constant 0 : index
    %c0_19 = arith.constant 0 : index
    %c0_20 = arith.constant 0 : index
    %59 = vector.load %arg8[%c0_18, %c0_19, %c0_20] : memref<1x1x128xf32, #tpu.memory_space<vmem>>, vector<1x1x128xf32>
    %60 = vector.shape_cast %59 : vector<1x1x128xf32> to vector<1x128xf32>
    %61 = vector.shape_cast %58 : vector<1x128xf32> to vector<1x1x128xf32>
    tpu.vector_store %arg8[%c0_18, %c0_19, %c0_20], %61 {strides = array<i32>} : memref<1x1x128xf32, #tpu.memory_space<vmem>>, vector<1x1x128xf32>,
    return
  }
  func.func @transform_0(%arg0: i32) -> (i32, i32, i32) {
    %c0_i32 = arith.constant 0 : i32
    %c0_i32_0 = arith.constant 0 : i32
    %c0_i32_1 = arith.constant 0 : i32
    return %arg0, %c0_i32, %c0_i32_0 : i32, i32, i32
  }
  func.func @transform_1(%arg0: i32) -> (i32, i32) {
    %c0_i32 = arith.constant 0 : i32
    %c0_i32_0 = arith.constant 0 : i32
    %c0_i32_1 = arith.constant 0 : i32
    return %c0_i32, %c0_i32_0 : i32, i32
  }
  func.func @transform_2(%arg0: i32) -> (i32, i32) {
    %c0_i32 = arith.constant 0 : i32
    %c0_i32_0 = arith.constant 0 : i32
    %c0_i32_1 = arith.constant 0 : i32
    return %c0_i32, %c0_i32_0 : i32, i32
  }
  func.func @transform_3(%arg0: i32) -> (i32, i32) {
    %c0_i32 = arith.constant 0 : i32
    %c0_i32_0 = arith.constant 0 : i32
    %c0_i32_1 = arith.constant 0 : i32
    return %c0_i32, %c0_i32_0 : i32, i32
  }
  func.func @transform_4(%arg0: i32) -> (i32, i32) {
    %c0_i32 = arith.constant 0 : i32
    %c0_i32_0 = arith.constant 0 : i32
    %c0_i32_1 = arith.constant 0 : i32
    return %c0_i32, %c0_i32_0 : i32, i32
  }
  func.func @transform_5(%arg0: i32) -> (i32, i32) {
    %c0_i32 = arith.constant 0 : i32
    %c0_i32_0 = arith.constant 0 : i32
    %c0_i32_1 = arith.constant 0 : i32
    return %c0_i32, %c0_i32_0 : i32, i32
  }
  func.func @transform_6(%arg0: i32) -> i32 {
    %c0_i32 = arith.constant 0 : i32
    %c0_i32_0 = arith.constant 0 : i32
    return %c0_i32 : i32
  }
  func.func @transform_7(%arg0: i32) -> (i32, i32, i32) {
    %c0_i32 = arith.constant 0 : i32
    %c0_i32_0 = arith.constant 0 : i32
    %c0_i32_1 = arith.constant 0 : i32
    return %arg0, %c0_i32, %c0_i32_0 : i32, i32, i32
  }
}

</mosaic_0001>

<bundles_post_ra>
// kernel: tpu_custom_call.1
= control target key start
LH: loop header
LB: loop body
LE: loop exit
PB: predicated region body
PF: predicated region fallthrough
CT: control target
= control target key end

     0   :  { %13 = vsyncpa [#allocation4], 0  ;;  %s3404_s0 = inlined_call_operand.hbm [shape: s32[1,1,2048], index: 0, kind: input, shape index: {}]   ;;  %s3405_s1 = inlined_call_operand.vmem [shape: f32[32,128], index: 1, kind: input, shape index: {}]   ;;  %s3406_s2 = inlined_call_operand.hbm [shape: f32[32,32], index: 2, kind: input, shape index: {}]   ;;  %s3407_s3 = inlined_call_operand.hbm [shape: f32[32,32], index: 3, kind: input, shape index: {}]   ;;  %s3408_s4 = inlined_call_operand.vmem [shape: f32[32,1], index: 4, kind: input, shape index: {}]   ;;  %s3409_s5 = inlined_call_operand.vmem [shape: f32[1,32], index: 5, kind: input, shape index: {}]   ;;  %s3410_s6 = inlined_call_operand.<no memory space> [shape: f32[1], index: 6, kind: input, shape index: {}]   ;;  %s3411_s7 = inlined_call_operand.hbm [shape: f32[1,1,128], index: 7, kind: output, shape index: {}]  }
   0x1   :  { %14 = vsyncpa [#allocation7], 0  ;;  %s33_s26 = sshll.u32 %s3406_s2, 4  ;;  %s34_s26 = int_to_ptr.hbm [resolvable:$true] %s33_s26 }
   0x2   :  { %15 = vsyncpa [#allocation5], 0  ;;  %s2245_s27 = smov [#allocation6]   ;;  %s21_s8 = sshll.u32 %s3404_s0, 4  ;;  %s22_s8 = int_to_ptr.hbm [resolvable:$true] %s21_s8 }
   0x3   :  { %s35_s28 = sshll.u32 %s2245_s27, 4  ;;  %s2246_s9 = smov 128   ;;  %s36_s28 = int_to_ptr.vmem [resolvable:$true] %s35_s28 }
   0x4   :  { %s2247_s10 = smov 8   ;;  %s2248_s11 = smov [#allocation3]  }
   0x5   :  { %41 = dma.hbm_to_vmem [thread:$0]  %s34_s26, 512, %s36_s28, [#allocation7], %s2246_s9, %s2246_s9, %s2247_s10  }
   0x6   :  { %s23_s12 = sshll.u32 %s2248_s11, 4  ;;  %s46_s15 = sshll.u32 %s3407_s3, 4  ;;  %s24_s12 = int_to_ptr.vmem [resolvable:$true] %s23_s12  ;;  %s47_s15 = int_to_ptr.hbm [resolvable:$true] %s46_s15 }
   0x7   :  { %26 = dma.hbm_to_vmem [thread:$0]  %s22_s8, 256, %s24_s12, [#allocation4]  }
   0x8   :  { %s2249_s2 = smov [#allocation8]  }
   0x9   :  { %s48_s16 = sshll.u32 %s2249_s2, 4  ;;  %s49_s16 = int_to_ptr.vmem [resolvable:$true] %s48_s16 }
   0xa   :  { %54 = dma.hbm_to_vmem [thread:$0]  %s47_s15, 512, %s49_s16, [#allocation7], %s2246_s9, %s2246_s9, %s2247_s10  }
   0xb   :  { %2239 = dma.done.wait [#allocation4], 256  }
   0xc   :  { %2240 = vsyncadd [#allocation4], 4294967040 }
   0xd   :  { %2241 = dma.done.wait [#allocation7], 1024  }
   0xe   :  { %2242 = vsyncadd [#allocation7], 4294966272  ;;  %v75_v0 = vlaneseq  ;;  %v2310_v4 = vld [vmem:[#allocation3] sm:$0xff]  ;;  %v2250_v11 = vmov 1.0   ;;  %v2620_v28 = vld [vmem:[%s3405_s1 + $0x8] sm:$0xff] }
   0xf   :  { %v2316_v6 = vperm.slane %v2310_v4, 0  ;;  %v2319_v7 = vperm.slane %v2310_v4, 2  ;;  %v2322_v8 = vperm.slane %v2310_v4, 1  ;;  %v2325_v9 = vperm.slane %v2310_v4, 3  ;;  %v2557_v25 = vld [vmem:[%s3405_s1] sm:$0xff]  ;;  %v2677_v29 = vld [vmem:[%s3405_s1 + $0x10] sm:$0xff] }
  0x10   :  { %v2302_v1 = vshrl.u32 %v75_v0, 7  ;;  %v2541_v23 = vperm.slane %v2310_v4, 4  ;;  %v2544_v24 = vperm.slane %v2310_v4, 6  ;;  %v2560_v26 = vperm.slane %v2310_v4, 5  ;;  %v2734_v30 = vld [vmem:[%s3405_s1 + $0x18] sm:$0xff]  ;;  %v2762_v31 = vld [vmem:[#allocation3 + $0x8] sm:$0xff] }
  0x11   :  { %v2569_v27 = vperm.slane %v2310_v4, 7  ;;  %v2783_v32 = vperm.slane %v2762_v31, 0  ;;  %v2786_v33 = vperm.slane %v2762_v31, 2  ;;  %v2797_v34 = vperm.slane %v2762_v31, 1 }
  0x12   :  { %v2305_v2 = vadd.s32 120, %v2302_v1  ;;  %v2308_v3 = vadd.s32 112, %v2302_v1  ;;  %v2313_v5 = vadd.s32 104, %v2302_v1  ;;  %v2328_v10 = vadd.s32 96, %v2302_v1 }
  0x13   :  { %v2355_v12 = vadd.s32 88, %v2302_v1  ;;  %v2370_v13 = vadd.s32 80, %v2302_v1  ;;  %v2388_v14 = vadd.s32 72, %v2302_v1  ;;  %v2403_v15 = vadd.s32 64, %v2302_v1 }
  0x14   :  { %vm348_vm0 = vcmp.eq.s32.totalorder %v2305_v2, %v2316_v6  ;;  %vm350_vm1 = vcmp.eq.s32.totalorder %v2305_v2, %v2319_v7  ;;  %vm332_vm2 = vcmp.eq.s32.totalorder %v2308_v3, %v2316_v6  ;;  %vm349_vm3 = vcmp.eq.s32.totalorder %v2305_v2, %v2322_v8 }
  0x15   :  { %1843 = vmatpush.msk.msra.mxu0 %vm348_vm0, %v2250_v11  ;;  %1875 = vmatpush.msk.msra.mxu2 %vm350_vm1, %v2250_v11  ;;  %vm334_vm4 = vcmp.eq.s32.totalorder %v2308_v3, %v2319_v7  ;;  %vm351_vm5 = vcmp.eq.s32.totalorder %v2305_v2, %v2325_v9  ;;  %vm316_vm6 = vcmp.eq.s32.totalorder %v2313_v5, %v2316_v6  ;;  %v2418_v16 = vadd.s32 56, %v2302_v1 }
  0x16   :  { %1859 = vmatpush.msk.msra.mxu1 %vm349_vm3, %v2250_v11  ;;  %1891 = vmatpush.msk.msra.mxu3 %vm351_vm5, %v2250_v11  ;;  %vm333_vm7 = vcmp.eq.s32.totalorder %v2308_v3, %v2322_v8  ;;  %vm318_vm8 = vcmp.eq.s32.totalorder %v2313_v5, %v2319_v7  ;;  %vm335_vm9 = vcmp.eq.s32.totalorder %v2308_v3, %v2325_v9  ;;  %v2433_v17 = vadd.s32 48, %v2302_v1 }
  0x17   :  { %1844 = vmatpush.msk.msra.mxu0 %vm332_vm2, %v2250_v11  ;;  %1876 = vmatpush.msk.msra.mxu2 %vm334_vm4, %v2250_v11  ;;  %vm317_vm10 = vcmp.eq.s32.totalorder %v2313_v5, %v2322_v8  ;;  %vm300_vm11 = vcmp.eq.s32.totalorder %v2328_v10, %v2316_v6  ;;  %vm302_vm12 = vcmp.eq.s32.totalorder %v2328_v10, %v2319_v7  ;;  %v2448_v18 = vadd.s32 40, %v2302_v1 }
  0x18   :  { %1860 = vmatpush.msk.msra.mxu1 %vm333_vm7, %v2250_v11  ;;  %1892 = vmatpush.msk.msra.mxu3 %vm335_vm9, %v2250_v11  ;;  %vm319_vm13 = vcmp.eq.s32.totalorder %v2313_v5, %v2325_v9  ;;  %vm301_vm14 = vcmp.eq.s32.totalorder %v2328_v10, %v2322_v8  ;;  %vm303_vm15 = vcmp.eq.s32.totalorder %v2328_v10, %v2325_v9  ;;  %v2463_v19 = vadd.s32 32, %v2302_v1 }
  0x19   :  { %1845 = vmatpush.msk.msra.mxu0 %vm316_vm6, %v2250_v11  ;;  %1877 = vmatpush.msk.msra.mxu2 %vm318_vm8, %v2250_v11  ;;  %vm284_vm0 = vcmp.eq.s32.totalorder %v2355_v12, %v2316_v6  ;;  %vm286_vm1 = vcmp.eq.s32.totalorder %v2355_v12, %v2319_v7  ;;  %vm285_vm2 = vcmp.eq.s32.totalorder %v2355_v12, %v2322_v8  ;;  %v2478_v20 = vadd.s32 24, %v2302_v1 }
  0x1a   :  { %1861 = vmatpush.msk.msra.mxu1 %vm317_vm10, %v2250_v11  ;;  %1893 = vmatpush.msk.msra.mxu3 %vm319_vm13, %v2250_v11  ;;  %vm287_vm3 = vcmp.eq.s32.totalorder %v2355_v12, %v2325_v9  ;;  %vm268_vm4 = vcmp.eq.s32.totalorder %v2370_v13, %v2316_v6  ;;  %vm270_vm5 = vcmp.eq.s32.totalorder %v2370_v13, %v2319_v7  ;;  %v2493_v21 = vadd.s32 16, %v2302_v1 }
  0x1b   :  { %1846 = vmatpush.msk.msra.mxu0 %vm300_vm11, %v2250_v11  ;;  %1878 = vmatpush.msk.msra.mxu2 %vm302_vm12, %v2250_v11  ;;  %vm269_vm6 = vcmp.eq.s32.totalorder %v2370_v13, %v2322_v8  ;;  %vm271_vm7 = vcmp.eq.s32.totalorder %v2370_v13, %v2325_v9  ;;  %vm252_vm8 = vcmp.eq.s32.totalorder %v2388_v14, %v2316_v6  ;;  %v2508_v22 = vadd.s32 8, %v2302_v1 }
  0x1c   :  { %1862 = vmatpush.msk.msra.mxu1 %vm301_vm14, %v2250_v11  ;;  %1894 = vmatpush.msk.msra.mxu3 %vm303_vm15, %v2250_v11  ;;  %vm254_vm9 = vcmp.eq.s32.totalorder %v2388_v14, %v2319_v7  ;;  %vm253_vm10 = vcmp.eq.s32.totalorder %v2388_v14, %v2322_v8  ;;  %vm255_vm11 = vcmp.eq.s32.totalorder %v2388_v14, %v2325_v9  ;;  %v2806_v35 = vperm.slane %v2762_v31, 3 }
  0x1d   :  { %1847 = vmatpush.msk.msra.mxu0 %vm284_vm0, %v2250_v11  ;;  %1879 = vmatpush.msk.msra.mxu2 %vm286_vm1, %v2250_v11  ;;  %vm236_vm12 = vcmp.eq.s32.totalorder %v2403_v15, %v2316_v6  ;;  %vm238_vm13 = vcmp.eq.s32.totalorder %v2403_v15, %v2319_v7  ;;  %vm237_vm14 = vcmp.eq.s32.totalorder %v2403_v15, %v2322_v8  ;;  %v3003_v36 = vperm.slane %v2762_v31, 4 }
  0x1e   :  { %1863 = vmatpush.msk.msra.mxu1 %vm285_vm2, %v2250_v11  ;;  %1895 = vmatpush.msk.msra.mxu3 %vm287_vm3, %v2250_v11  ;;  %vm239_vm15 = vcmp.eq.s32.totalorder %v2403_v15, %v2325_v9  ;;  %vm220_vm0 = vcmp.eq.s32.totalorder %v2418_v16, %v2316_v6  ;;  %vm222_vm1 = vcmp.eq.s32.totalorder %v2418_v16, %v2319_v7  ;;  %v3006_v37 = vperm.slane %v2762_v31, 6 }
  0x1f   :  { %1848 = vmatpush.msk.msra.mxu0 %vm268_vm4, %v2250_v11  ;;  %1880 = vmatpush.msk.msra.mxu2 %vm270_vm5, %v2250_v11  ;;  %vm221_vm2 = vcmp.eq.s32.totalorder %v2418_v16, %v2322_v8  ;;  %vm223_vm3 = vcmp.eq.s32.totalorder %v2418_v16, %v2325_v9  ;;  %vm204_vm4 = vcmp.eq.s32.totalorder %v2433_v17, %v2316_v6  ;;  %v3023_v38 = vperm.slane %v2762_v31, 7 }
  0x20   :  { %1864 = vmatpush.msk.msra.mxu1 %vm269_vm6, %v2250_v11  ;;  %1896 = vmatpush.msk.msra.mxu3 %vm271_vm7, %v2250_v11  ;;  %vm206_vm5 = vcmp.eq.s32.totalorder %v2433_v17, %v2319_v7  ;;  %vm205_vm6 = vcmp.eq.s32.totalorder %v2433_v17, %v2322_v8  ;;  %vm207_vm7 = vcmp.eq.s32.totalorder %v2433_v17, %v2325_v9  ;;  %v3026_v39 = vperm.slane %v2762_v31, 5 }
  0x21   :  { %1849 = vmatpush.msk.msra.mxu0 %vm252_vm8, %v2250_v11  ;;  %1881 = vmatpush.msk.msra.mxu2 %vm254_vm9, %v2250_v11  ;;  %vm188_vm8 = vcmp.eq.s32.totalorder %v2448_v18, %v2316_v6  ;;  %vm190_vm9 = vcmp.eq.s32.totalorder %v2448_v18, %v2319_v7 }
  0x22   :  { %1865 = vmatpush.msk.msra.mxu1 %vm253_vm10, %v2250_v11  ;;  %1897 = vmatpush.msk.msra.mxu3 %vm255_vm11, %v2250_v11  ;;  %vm189_vm10 = vcmp.eq.s32.totalorder %v2448_v18, %v2322_v8  ;;  %vm191_vm11 = vcmp.eq.s32.totalorder %v2448_v18, %v2325_v9 }
  0x23   :  { %1850 = vmatpush.msk.msra.mxu0 %vm236_vm12, %v2250_v11  ;;  %1882 = vmatpush.msk.msra.mxu2 %vm238_vm13, %v2250_v11  ;;  %vm172_vm12 = vcmp.eq.s32.totalorder %v2463_v19, %v2316_v6  ;;  %vm174_vm13 = vcmp.eq.s32.totalorder %v2463_v19, %v2319_v7 }
  0x24   :  { %1866 = vmatpush.msk.msra.mxu1 %vm237_vm14, %v2250_v11  ;;  %1898 = vmatpush.msk.msra.mxu3 %vm239_vm15, %v2250_v11  ;;  %vm173_vm14 = vcmp.eq.s32.totalorder %v2463_v19, %v2322_v8  ;;  %vm175_vm15 = vcmp.eq.s32.totalorder %v2463_v19, %v2325_v9 }
  0x25   :  { %1851 = vmatpush.msk.msra.mxu0 %vm220_vm0, %v2250_v11  ;;  %1883 = vmatpush.msk.msra.mxu2 %vm222_vm1, %v2250_v11  ;;  %vm156_vm0 = vcmp.eq.s32.totalorder %v2478_v20, %v2316_v6  ;;  %vm158_vm1 = vcmp.eq.s32.totalorder %v2478_v20, %v2319_v7 }
  0x26   :  { %1867 = vmatpush.msk.msra.mxu1 %vm221_vm2, %v2250_v11  ;;  %1899 = vmatpush.msk.msra.mxu3 %vm223_vm3, %v2250_v11  ;;  %vm157_vm2 = vcmp.eq.s32.totalorder %v2478_v20, %v2322_v8  ;;  %vm159_vm3 = vcmp.eq.s32.totalorder %v2478_v20, %v2325_v9 }
  0x27   :  { %1852 = vmatpush.msk.msra.mxu0 %vm204_vm4, %v2250_v11  ;;  %1884 = vmatpush.msk.msra.mxu2 %vm206_vm5, %v2250_v11  ;;  %vm140_vm4 = vcmp.eq.s32.totalorder %v2493_v21, %v2316_v6  ;;  %vm142_vm5 = vcmp.eq.s32.totalorder %v2493_v21, %v2319_v7 }
  0x28   :  { %1868 = vmatpush.msk.msra.mxu1 %vm205_vm6, %v2250_v11  ;;  %1900 = vmatpush.msk.msra.mxu3 %vm207_vm7, %v2250_v11  ;;  %vm141_vm6 = vcmp.eq.s32.totalorder %v2493_v21, %v2322_v8  ;;  %vm143_vm7 = vcmp.eq.s32.totalorder %v2493_v21, %v2325_v9 }
  0x29   :  { %1853 = vmatpush.msk.msra.mxu0 %vm188_vm8, %v2250_v11  ;;  %1885 = vmatpush.msk.msra.mxu2 %vm190_vm9, %v2250_v11  ;;  %vm124_vm8 = vcmp.eq.s32.totalorder %v2508_v22, %v2316_v6  ;;  %vm126_vm9 = vcmp.eq.s32.totalorder %v2508_v22, %v2319_v7 }
  0x2a   :  { %1869 = vmatpush.msk.msra.mxu1 %vm189_vm10, %v2250_v11  ;;  %1901 = vmatpush.msk.msra.mxu3 %vm191_vm11, %v2250_v11  ;;  %vm125_vm10 = vcmp.eq.s32.totalorder %v2508_v22, %v2322_v8  ;;  %vm127_vm11 = vcmp.eq.s32.totalorder %v2508_v22, %v2325_v9 }
  0x2b   :  { %1854 = vmatpush.msk.msra.mxu0 %vm172_vm12, %v2250_v11  ;;  %1886 = vmatpush.msk.msra.mxu2 %vm174_vm13, %v2250_v11  ;;  %vm108_vm12 = vcmp.eq.s32.totalorder %v2302_v1, %v2316_v6  ;;  %vm110_vm13 = vcmp.eq.s32.totalorder %v2302_v1, %v2319_v7 }
  0x2c   :  { %1870 = vmatpush.msk.msra.mxu1 %vm173_vm14, %v2250_v11  ;;  %1902 = vmatpush.msk.msra.mxu3 %vm175_vm15, %v2250_v11  ;;  %vm109_vm14 = vcmp.eq.s32.totalorder %v2302_v1, %v2322_v8  ;;  %vm111_vm15 = vcmp.eq.s32.totalorder %v2302_v1, %v2325_v9 }
  0x2d   :  { %1855 = vmatpush.msk.msra.mxu0 %vm156_vm0, %v2250_v11  ;;  %1887 = vmatpush.msk.msra.mxu2 %vm158_vm1, %v2250_v11  ;;  %vm352_vm0 = vcmp.eq.s32.totalorder %v2305_v2, %v2541_v23  ;;  %vm354_vm1 = vcmp.eq.s32.totalorder %v2305_v2, %v2544_v24 }
  0x2e   :  { %1871 = vmatpush.msk.msra.mxu1 %vm157_vm2, %v2250_v11  ;;  %1903 = vmatpush.msk.msra.mxu3 %vm159_vm3, %v2250_v11  ;;  %vm336_vm2 = vcmp.eq.s32.totalorder %v2308_v3, %v2541_v23  ;;  %vm353_vm3 = vcmp.eq.s32.totalorder %v2305_v2, %v2560_v26 }
  0x2f   :  { %1856 = vmatpush.msk.msra.mxu0 %vm140_vm4, %v2250_v11  ;;  %1888 = vmatpush.msk.msra.mxu2 %vm142_vm5, %v2250_v11  ;;  %vm338_vm4 = vcmp.eq.s32.totalorder %v2308_v3, %v2544_v24  ;;  %vm355_vm5 = vcmp.eq.s32.totalorder %v2305_v2, %v2569_v27 }
  0x30   :  { %1872 = vmatpush.msk.msra.mxu1 %vm141_vm6, %v2250_v11  ;;  %1904 = vmatpush.msk.msra.mxu3 %vm143_vm7, %v2250_v11  ;;  %vm320_vm6 = vcmp.eq.s32.totalorder %v2313_v5, %v2541_v23  ;;  %vm337_vm7 = vcmp.eq.s32.totalorder %v2308_v3, %v2560_v26 }
  0x31   :  { %1857 = vmatpush.msk.msra.mxu0 %vm124_vm8, %v2250_v11  ;;  %1889 = vmatpush.msk.msra.mxu2 %vm126_vm9, %v2250_v11  ;;  %vm322_vm8 = vcmp.eq.s32.totalorder %v2313_v5, %v2544_v24  ;;  %vm339_vm9 = vcmp.eq.s32.totalorder %v2308_v3, %v2569_v27 }
  0x32   :  { %1873 = vmatpush.msk.msra.mxu1 %vm125_vm10, %v2250_v11  ;;  %1905 = vmatpush.msk.msra.mxu3 %vm127_vm11, %v2250_v11  ;;  %vm304_vm10 = vcmp.eq.s32.totalorder %v2328_v10, %v2541_v23  ;;  %vm321_vm11 = vcmp.eq.s32.totalorder %v2313_v5, %v2560_v26 }
  0x33   :  { %1858 = vmatpush.msk.msra.mxu0 %vm108_vm12, %v2250_v11  ;;  %1890 = vmatpush.msk.msra.mxu2 %vm110_vm13, %v2250_v11  ;;  %vm306_vm12 = vcmp.eq.s32.totalorder %v2328_v10, %v2544_v24  ;;  %vm323_vm13 = vcmp.eq.s32.totalorder %v2313_v5, %v2569_v27 }
  0x34   :  { %896 = vmatmul.f32.vlgmr.msra.gmra.mxu0 %v2557_v25  ;;  %954 = vmatmul.f32.vlgmr.msra.gmra.mxu2 %v2557_v25 }
  0x35   :  { %1874 = vmatpush.msk.msra.mxu1 %vm109_vm14, %v2250_v11  ;;  %1906 = vmatpush.msk.msra.mxu3 %vm111_vm15, %v2250_v11  ;;  %vm288_vm14 = vcmp.eq.s32.totalorder %v2355_v12, %v2541_v23  ;;  %vm305_vm15 = vcmp.eq.s32.totalorder %v2328_v10, %v2560_v26 }
  0x36   :  { %1907 = vmatpush.msk.msrb.mxu0 %vm352_vm0, %v2250_v11  ;;  %1939 = vmatpush.msk.msrb.mxu2 %vm354_vm1, %v2250_v11  ;;  %vm290_vm0 = vcmp.eq.s32.totalorder %v2355_v12, %v2544_v24  ;;  %vm307_vm1 = vcmp.eq.s32.totalorder %v2328_v10, %v2569_v27 }
  0x37   :  { %925 = vmatmul.f32.vlgmr.msra.gmra.mxu1 %v2557_v25  ;;  %983 = vmatmul.f32.vlgmr.msra.gmra.mxu3 %v2557_v25 }
  0x38   :  { %1908 = vmatpush.msk.msrb.mxu0 %vm336_vm2, %v2250_v11  ;;  %1923 = vmatpush.msk.msrb.mxu1 %vm353_vm3, %v2250_v11  ;;  %vm272_vm2 = vcmp.eq.s32.totalorder %v2370_v13, %v2541_v23  ;;  %vm289_vm3 = vcmp.eq.s32.totalorder %v2355_v12, %v2560_v26 }
  0x39   :  { %1940 = vmatpush.msk.msrb.mxu2 %vm338_vm4, %v2250_v11  ;;  %1955 = vmatpush.msk.msrb.mxu3 %vm355_vm5, %v2250_v11  ;;  %vm274_vm4 = vcmp.eq.s32.totalorder %v2370_v13, %v2544_v24  ;;  %vm291_vm5 = vcmp.eq.s32.totalorder %v2355_v12, %v2569_v27 }
  0x3a   :  { %1909 = vmatpush.msk.msrb.mxu0 %vm320_vm6, %v2250_v11  ;;  %1924 = vmatpush.msk.msrb.mxu1 %vm337_vm7, %v2250_v11  ;;  %vm256_vm6 = vcmp.eq.s32.totalorder %v2388_v14, %v2541_v23  ;;  %vm273_vm7 = vcmp.eq.s32.totalorder %v2370_v13, %v2560_v26 }
  0x3b   :  { %1941 = vmatpush.msk.msrb.mxu2 %vm322_vm8, %v2250_v11  ;;  %1956 = vmatpush.msk.msrb.mxu3 %vm339_vm9, %v2250_v11  ;;  %vm258_vm8 = vcmp.eq.s32.totalorder %v2388_v14, %v2544_v24  ;;  %vm275_vm9 = vcmp.eq.s32.totalorder %v2370_v13, %v2569_v27 }
  0x3c   :  { %1910 = vmatpush.msk.msrb.mxu0 %vm304_vm10, %v2250_v11  ;;  %1925 = vmatpush.msk.msrb.mxu1 %vm321_vm11, %v2250_v11  ;;  %vm240_vm10 = vcmp.eq.s32.totalorder %v2403_v15, %v2541_v23  ;;  %vm257_vm11 = vcmp.eq.s32.totalorder %v2388_v14, %v2560_v26 }
  0x3d   :  { %1942 = vmatpush.msk.msrb.mxu2 %vm306_vm12, %v2250_v11  ;;  %1957 = vmatpush.msk.msrb.mxu3 %vm323_vm13, %v2250_v11  ;;  %vm242_vm12 = vcmp.eq.s32.totalorder %v2403_v15, %v2544_v24  ;;  %vm259_vm13 = vcmp.eq.s32.totalorder %v2388_v14, %v2569_v27 }
  0x3e   :  { %899 = vmatmul.f32.gmra.mxu0 %v2620_v28  ;;  %957 = vmatmul.f32.gmra.mxu2 %v2620_v28 }
  0x3f   :  { %1911 = vmatpush.msk.msrb.mxu0 %vm288_vm14, %v2250_v11  ;;  %1926 = vmatpush.msk.msrb.mxu1 %vm305_vm15, %v2250_v11  ;;  %vm224_vm14 = vcmp.eq.s32.totalorder %v2418_v16, %v2541_v23  ;;  %vm241_vm15 = vcmp.eq.s32.totalorder %v2403_v15, %v2560_v26 }
  0x40   :  { %1943 = vmatpush.msk.msrb.mxu2 %vm290_vm0, %v2250_v11  ;;  %1958 = vmatpush.msk.msrb.mxu3 %vm307_vm1, %v2250_v11  ;;  %vm226_vm0 = vcmp.eq.s32.totalorder %v2418_v16, %v2544_v24  ;;  %vm243_vm1 = vcmp.eq.s32.totalorder %v2403_v15, %v2569_v27 }
  0x41   :  { %928 = vmatmul.f32.gmra.mxu1 %v2620_v28  ;;  %986 = vmatmul.f32.gmra.mxu3 %v2620_v28 }
  0x42   :  { %1912 = vmatpush.msk.msrb.mxu0 %vm272_vm2, %v2250_v11  ;;  %1927 = vmatpush.msk.msrb.mxu1 %vm289_vm3, %v2250_v11  ;;  %vm208_vm2 = vcmp.eq.s32.totalorder %v2433_v17, %v2541_v23  ;;  %vm225_vm3 = vcmp.eq.s32.totalorder %v2418_v16, %v2560_v26 }
  0x43   :  { %1944 = vmatpush.msk.msrb.mxu2 %vm274_vm4, %v2250_v11  ;;  %1959 = vmatpush.msk.msrb.mxu3 %vm291_vm5, %v2250_v11  ;;  %vm210_vm4 = vcmp.eq.s32.totalorder %v2433_v17, %v2544_v24  ;;  %vm227_vm5 = vcmp.eq.s32.totalorder %v2418_v16, %v2569_v27 }
  0x44   :  { %1913 = vmatpush.msk.msrb.mxu0 %vm256_vm6, %v2250_v11  ;;  %1928 = vmatpush.msk.msrb.mxu1 %vm273_vm7, %v2250_v11  ;;  %vm192_vm6 = vcmp.eq.s32.totalorder %v2448_v18, %v2541_v23  ;;  %vm209_vm7 = vcmp.eq.s32.totalorder %v2433_v17, %v2560_v26 }
  0x45   :  { %1945 = vmatpush.msk.msrb.mxu2 %vm258_vm8, %v2250_v11  ;;  %1960 = vmatpush.msk.msrb.mxu3 %vm275_vm9, %v2250_v11  ;;  %vm194_vm8 = vcmp.eq.s32.totalorder %v2448_v18, %v2544_v24  ;;  %vm211_vm9 = vcmp.eq.s32.totalorder %v2433_v17, %v2569_v27 }
  0x46   :  { %1914 = vmatpush.msk.msrb.mxu0 %vm240_vm10, %v2250_v11  ;;  %1929 = vmatpush.msk.msrb.mxu1 %vm257_vm11, %v2250_v11  ;;  %vm176_vm10 = vcmp.eq.s32.totalorder %v2463_v19, %v2541_v23  ;;  %vm193_vm11 = vcmp.eq.s32.totalorder %v2448_v18, %v2560_v26 }
  0x47   :  { %1946 = vmatpush.msk.msrb.mxu2 %vm242_vm12, %v2250_v11  ;;  %1961 = vmatpush.msk.msrb.mxu3 %vm259_vm13, %v2250_v11  ;;  %vm178_vm12 = vcmp.eq.s32.totalorder %v2463_v19, %v2544_v24  ;;  %vm195_vm13 = vcmp.eq.s32.totalorder %v2448_v18, %v2569_v27 }
  0x48   :  { %902 = vmatmul.f32.gmra.mxu0 %v2677_v29  ;;  %960 = vmatmul.f32.gmra.mxu2 %v2677_v29 }
  0x49   :  { %1915 = vmatpush.msk.msrb.mxu0 %vm224_vm14, %v2250_v11  ;;  %1930 = vmatpush.msk.msrb.mxu1 %vm241_vm15, %v2250_v11  ;;  %vm160_vm14 = vcmp.eq.s32.totalorder %v2478_v20, %v2541_v23  ;;  %vm177_vm15 = vcmp.eq.s32.totalorder %v2463_v19, %v2560_v26 }
  0x4a   :  { %1947 = vmatpush.msk.msrb.mxu2 %vm226_vm0, %v2250_v11  ;;  %1962 = vmatpush.msk.msrb.mxu3 %vm243_vm1, %v2250_v11  ;;  %vm162_vm0 = vcmp.eq.s32.totalorder %v2478_v20, %v2544_v24  ;;  %vm179_vm1 = vcmp.eq.s32.totalorder %v2463_v19, %v2569_v27 }
  0x4b   :  { %931 = vmatmul.f32.gmra.mxu1 %v2677_v29  ;;  %989 = vmatmul.f32.gmra.mxu3 %v2677_v29 }
  0x4c   :  { %1916 = vmatpush.msk.msrb.mxu0 %vm208_vm2, %v2250_v11  ;;  %1931 = vmatpush.msk.msrb.mxu1 %vm225_vm3, %v2250_v11  ;;  %vm144_vm2 = vcmp.eq.s32.totalorder %v2493_v21, %v2541_v23  ;;  %vm161_vm3 = vcmp.eq.s32.totalorder %v2478_v20, %v2560_v26 }
  0x4d   :  { %1948 = vmatpush.msk.msrb.mxu2 %vm210_vm4, %v2250_v11  ;;  %1963 = vmatpush.msk.msrb.mxu3 %vm227_vm5, %v2250_v11  ;;  %vm146_vm4 = vcmp.eq.s32.totalorder %v2493_v21, %v2544_v24  ;;  %vm163_vm5 = vcmp.eq.s32.totalorder %v2478_v20, %v2569_v27 }
  0x4e   :  { %1917 = vmatpush.msk.msrb.mxu0 %vm192_vm6, %v2250_v11  ;;  %1932 = vmatpush.msk.msrb.mxu1 %vm209_vm7, %v2250_v11  ;;  %vm128_vm6 = vcmp.eq.s32.totalorder %v2508_v22, %v2541_v23  ;;  %vm145_vm7 = vcmp.eq.s32.totalorder %v2493_v21, %v2560_v26 }
  0x4f   :  { %1949 = vmatpush.msk.msrb.mxu2 %vm194_vm8, %v2250_v11  ;;  %1964 = vmatpush.msk.msrb.mxu3 %vm211_vm9, %v2250_v11  ;;  %vm130_vm8 = vcmp.eq.s32.totalorder %v2508_v22, %v2544_v24  ;;  %vm147_vm9 = vcmp.eq.s32.totalorder %v2493_v21, %v2569_v27 }
  0x50   :  { %1918 = vmatpush.msk.msrb.mxu0 %vm176_vm10, %v2250_v11  ;;  %1933 = vmatpush.msk.msrb.mxu1 %vm193_vm11, %v2250_v11  ;;  %vm112_vm10 = vcmp.eq.s32.totalorder %v2302_v1, %v2541_v23  ;;  %vm129_vm11 = vcmp.eq.s32.totalorder %v2508_v22, %v2560_v26 }
  0x51   :  { %1950 = vmatpush.msk.msrb.mxu2 %vm178_vm12, %v2250_v11  ;;  %1965 = vmatpush.msk.msrb.mxu3 %vm195_vm13, %v2250_v11  ;;  %vm114_vm12 = vcmp.eq.s32.totalorder %v2302_v1, %v2544_v24  ;;  %vm131_vm13 = vcmp.eq.s32.totalorder %v2508_v22, %v2569_v27 }
  0x52   :  { %905 = vmatmul.f32.gmra.mxu0 %v2734_v30  ;;  %963 = vmatmul.f32.gmra.mxu2 %v2734_v30 }
  0x53   :  { %1919 = vmatpush.msk.msrb.mxu0 %vm160_vm14, %v2250_v11  ;;  %1934 = vmatpush.msk.msrb.mxu1 %vm177_vm15, %v2250_v11  ;;  %vm113_vm14 = vcmp.eq.s32.totalorder %v2302_v1, %v2560_v26  ;;  %vm115_vm15 = vcmp.eq.s32.totalorder %v2302_v1, %v2569_v27 }
  0x54   :  { %1951 = vmatpush.msk.msrb.mxu2 %vm162_vm0, %v2250_v11  ;;  %1966 = vmatpush.msk.msrb.mxu3 %vm179_vm1, %v2250_v11  ;;  %vm356_vm0 = vcmp.eq.s32.totalorder %v2305_v2, %v2783_v32  ;;  %vm358_vm1 = vcmp.eq.s32.totalorder %v2305_v2, %v2786_v33 }
  0x55   :  { %934 = vmatmul.f32.gmra.mxu1 %v2734_v30  ;;  %992 = vmatmul.f32.gmra.mxu3 %v2734_v30 }
  0x56   :  { %1920 = vmatpush.msk.msrb.mxu0 %vm144_vm2, %v2250_v11  ;;  %1935 = vmatpush.msk.msrb.mxu1 %vm161_vm3, %v2250_v11  ;;  %vm340_vm2 = vcmp.eq.s32.totalorder %v2308_v3, %v2783_v32  ;;  %vm357_vm3 = vcmp.eq.s32.totalorder %v2305_v2, %v2797_v34 }
  0x57   :  { %1952 = vmatpush.msk.msrb.mxu2 %vm146_vm4, %v2250_v11  ;;  %1967 = vmatpush.msk.msrb.mxu3 %vm163_vm5, %v2250_v11  ;;  %vm342_vm4 = vcmp.eq.s32.totalorder %v2308_v3, %v2786_v33  ;;  %vm359_vm5 = vcmp.eq.s32.totalorder %v2305_v2, %v2806_v35 }
  0x58   :  { %1921 = vmatpush.msk.msrb.mxu0 %vm128_vm6, %v2250_v11  ;;  %1936 = vmatpush.msk.msrb.mxu1 %vm145_vm7, %v2250_v11  ;;  %vm324_vm6 = vcmp.eq.s32.totalorder %v2313_v5, %v2783_v32  ;;  %vm341_vm7 = vcmp.eq.s32.totalorder %v2308_v3, %v2797_v34 }
  0x59   :  { %1953 = vmatpush.msk.msrb.mxu2 %vm130_vm8, %v2250_v11  ;;  %1968 = vmatpush.msk.msrb.mxu3 %vm147_vm9, %v2250_v11  ;;  %vm326_vm8 = vcmp.eq.s32.totalorder %v2313_v5, %v2786_v33  ;;  %vm343_vm9 = vcmp.eq.s32.totalorder %v2308_v3, %v2806_v35 }
  0x5a   :  { %1922 = vmatpush.msk.msrb.mxu0 %vm112_vm10, %v2250_v11  ;;  %1937 = vmatpush.msk.msrb.mxu1 %vm129_vm11, %v2250_v11  ;;  %vm308_vm10 = vcmp.eq.s32.totalorder %v2328_v10, %v2783_v32  ;;  %vm325_vm11 = vcmp.eq.s32.totalorder %v2313_v5, %v2797_v34 }
  0x5b   :  { %1954 = vmatpush.msk.msrb.mxu2 %vm114_vm12, %v2250_v11  ;;  %1969 = vmatpush.msk.msrb.mxu3 %vm131_vm13, %v2250_v11  ;;  %vm310_vm12 = vcmp.eq.s32.totalorder %v2328_v10, %v2786_v33  ;;  %vm327_vm13 = vcmp.eq.s32.totalorder %v2313_v5, %v2806_v35 }
  0x5c   :  { %1012 = vmatmul.f32.vlgmr.msrb.gmra.mxu0 %v2557_v25  ;;  %1070 = vmatmul.f32.vlgmr.msrb.gmra.mxu2 %v2557_v25 }
  0x5d   :  { %1938 = vmatpush.msk.msrb.mxu1 %vm113_vm14, %v2250_v11  ;;  %1970 = vmatpush.msk.msrb.mxu3 %vm115_vm15, %v2250_v11  ;;  %vm292_vm14 = vcmp.eq.s32.totalorder %v2355_v12, %v2783_v32  ;;  %vm309_vm15 = vcmp.eq.s32.totalorder %v2328_v10, %v2797_v34 }
  0x5e   :  { %1971 = vmatpush.msk.msra.mxu0 %vm356_vm0, %v2250_v11  ;;  %2003 = vmatpush.msk.msra.mxu2 %vm358_vm1, %v2250_v11  ;;  %vm294_vm0 = vcmp.eq.s32.totalorder %v2355_v12, %v2786_v33  ;;  %vm311_vm1 = vcmp.eq.s32.totalorder %v2328_v10, %v2806_v35 }
  0x5f   :  { %1041 = vmatmul.f32.vlgmr.msrb.gmra.mxu1 %v2557_v25  ;;  %1099 = vmatmul.f32.vlgmr.msrb.gmra.mxu3 %v2557_v25 }
  0x60   :  { %1972 = vmatpush.msk.msra.mxu0 %vm340_vm2, %v2250_v11  ;;  %1987 = vmatpush.msk.msra.mxu1 %vm357_vm3, %v2250_v11  ;;  %vm276_vm2 = vcmp.eq.s32.totalorder %v2370_v13, %v2783_v32  ;;  %vm293_vm3 = vcmp.eq.s32.totalorder %v2355_v12, %v2797_v34 }
  0x61   :  { %2004 = vmatpush.msk.msra.mxu2 %vm342_vm4, %v2250_v11  ;;  %2019 = vmatpush.msk.msra.mxu3 %vm359_vm5, %v2250_v11  ;;  %vm278_vm4 = vcmp.eq.s32.totalorder %v2370_v13, %v2786_v33  ;;  %vm295_vm5 = vcmp.eq.s32.totalorder %v2355_v12, %v2806_v35 }
  0x62   :  { %1973 = vmatpush.msk.msra.mxu0 %vm324_vm6, %v2250_v11  ;;  %1988 = vmatpush.msk.msra.mxu1 %vm341_vm7, %v2250_v11  ;;  %vm260_vm6 = vcmp.eq.s32.totalorder %v2388_v14, %v2783_v32  ;;  %vm277_vm7 = vcmp.eq.s32.totalorder %v2370_v13, %v2797_v34 }
  0x63   :  { %2005 = vmatpush.msk.msra.mxu2 %vm326_vm8, %v2250_v11  ;;  %2020 = vmatpush.msk.msra.mxu3 %vm343_vm9, %v2250_v11  ;;  %vm262_vm8 = vcmp.eq.s32.totalorder %v2388_v14, %v2786_v33  ;;  %vm279_vm9 = vcmp.eq.s32.totalorder %v2370_v13, %v2806_v35 }
  0x64   :  { %1974 = vmatpush.msk.msra.mxu0 %vm308_vm10, %v2250_v11  ;;  %1989 = vmatpush.msk.msra.mxu1 %vm325_vm11, %v2250_v11  ;;  %vm244_vm10 = vcmp.eq.s32.totalorder %v2403_v15, %v2783_v32  ;;  %vm261_vm11 = vcmp.eq.s32.totalorder %v2388_v14, %v2797_v34 }
  0x65   :  { %2006 = vmatpush.msk.msra.mxu2 %vm310_vm12, %v2250_v11  ;;  %2021 = vmatpush.msk.msra.mxu3 %vm327_vm13, %v2250_v11  ;;  %vm246_vm12 = vcmp.eq.s32.totalorder %v2403_v15, %v2786_v33  ;;  %vm263_vm13 = vcmp.eq.s32.totalorder %v2388_v14, %v2806_v35 }
  0x66   :  { %1015 = vmatmul.f32.gmra.mxu0 %v2620_v28  ;;  %1073 = vmatmul.f32.gmra.mxu2 %v2620_v28 }
  0x67   :  { %1975 = vmatpush.msk.msra.mxu0 %vm292_vm14, %v2250_v11  ;;  %1990 = vmatpush.msk.msra.mxu1 %vm309_vm15, %v2250_v11  ;;  %vm228_vm14 = vcmp.eq.s32.totalorder %v2418_v16, %v2783_v32  ;;  %vm245_vm15 = vcmp.eq.s32.totalorder %v2403_v15, %v2797_v34 }
  0x68   :  { %2007 = vmatpush.msk.msra.mxu2 %vm294_vm0, %v2250_v11  ;;  %2022 = vmatpush.msk.msra.mxu3 %vm311_vm1, %v2250_v11  ;;  %vm230_vm0 = vcmp.eq.s32.totalorder %v2418_v16, %v2786_v33  ;;  %vm247_vm1 = vcmp.eq.s32.totalorder %v2403_v15, %v2806_v35 }
  0x69   :  { %1044 = vmatmul.f32.gmra.mxu1 %v2620_v28  ;;  %1102 = vmatmul.f32.gmra.mxu3 %v2620_v28 }
  0x6a   :  { %1976 = vmatpush.msk.msra.mxu0 %vm276_vm2, %v2250_v11  ;;  %1991 = vmatpush.msk.msra.mxu1 %vm293_vm3, %v2250_v11  ;;  %vm212_vm2 = vcmp.eq.s32.totalorder %v2433_v17, %v2783_v32  ;;  %vm229_vm3 = vcmp.eq.s32.totalorder %v2418_v16, %v2797_v34 }
  0x6b   :  { %2008 = vmatpush.msk.msra.mxu2 %vm278_vm4, %v2250_v11  ;;  %2023 = vmatpush.msk.msra.mxu3 %vm295_vm5, %v2250_v11  ;;  %vm214_vm4 = vcmp.eq.s32.totalorder %v2433_v17, %v2786_v33  ;;  %vm231_vm5 = vcmp.eq.s32.totalorder %v2418_v16, %v2806_v35 }
  0x6c   :  { %1977 = vmatpush.msk.msra.mxu0 %vm260_vm6, %v2250_v11  ;;  %1992 = vmatpush.msk.msra.mxu1 %vm277_vm7, %v2250_v11  ;;  %vm196_vm6 = vcmp.eq.s32.totalorder %v2448_v18, %v2783_v32  ;;  %vm213_vm7 = vcmp.eq.s32.totalorder %v2433_v17, %v2797_v34 }
  0x6d   :  { %2009 = vmatpush.msk.msra.mxu2 %vm262_vm8, %v2250_v11  ;;  %2024 = vmatpush.msk.msra.mxu3 %vm279_vm9, %v2250_v11  ;;  %vm198_vm8 = vcmp.eq.s32.totalorder %v2448_v18, %v2786_v33  ;;  %vm215_vm9 = vcmp.eq.s32.totalorder %v2433_v17, %v2806_v35 }
  0x6e   :  { %1978 = vmatpush.msk.msra.mxu0 %vm244_vm10, %v2250_v11  ;;  %1993 = vmatpush.msk.msra.mxu1 %vm261_vm11, %v2250_v11  ;;  %vm180_vm10 = vcmp.eq.s32.totalorder %v2463_v19, %v2783_v32  ;;  %vm197_vm11 = vcmp.eq.s32.totalorder %v2448_v18, %v2797_v34 }
  0x6f   :  { %2010 = vmatpush.msk.msra.mxu2 %vm246_vm12, %v2250_v11  ;;  %2025 = vmatpush.msk.msra.mxu3 %vm263_vm13, %v2250_v11  ;;  %vm182_vm12 = vcmp.eq.s32.totalorder %v2463_v19, %v2786_v33  ;;  %vm199_vm13 = vcmp.eq.s32.totalorder %v2448_v18, %v2806_v35 }
  0x70   :  { %1018 = vmatmul.f32.gmra.mxu0 %v2677_v29  ;;  %1076 = vmatmul.f32.gmra.mxu2 %v2677_v29 }
  0x71   :  { %1979 = vmatpush.msk.msra.mxu0 %vm228_vm14, %v2250_v11  ;;  %1994 = vmatpush.msk.msra.mxu1 %vm245_vm15, %v2250_v11  ;;  %vm164_vm14 = vcmp.eq.s32.totalorder %v2478_v20, %v2783_v32  ;;  %vm181_vm15 = vcmp.eq.s32.totalorder %v2463_v19, %v2797_v34 }
  0x72   :  { %2011 = vmatpush.msk.msra.mxu2 %vm230_vm0, %v2250_v11  ;;  %2026 = vmatpush.msk.msra.mxu3 %vm247_vm1, %v2250_v11  ;;  %vm166_vm0 = vcmp.eq.s32.totalorder %v2478_v20, %v2786_v33  ;;  %vm183_vm1 = vcmp.eq.s32.totalorder %v2463_v19, %v2806_v35 }
  0x73   :  { %1047 = vmatmul.f32.gmra.mxu1 %v2677_v29  ;;  %1105 = vmatmul.f32.gmra.mxu3 %v2677_v29 }
  0x74   :  { %1980 = vmatpush.msk.msra.mxu0 %vm212_vm2, %v2250_v11  ;;  %1995 = vmatpush.msk.msra.mxu1 %vm229_vm3, %v2250_v11  ;;  %vm148_vm2 = vcmp.eq.s32.totalorder %v2493_v21, %v2783_v32  ;;  %vm165_vm3 = vcmp.eq.s32.totalorder %v2478_v20, %v2797_v34 }
  0x75   :  { %2012 = vmatpush.msk.msra.mxu2 %vm214_vm4, %v2250_v11  ;;  %2027 = vmatpush.msk.msra.mxu3 %vm231_vm5, %v2250_v11  ;;  %vm150_vm4 = vcmp.eq.s32.totalorder %v2493_v21, %v2786_v33  ;;  %vm167_vm5 = vcmp.eq.s32.totalorder %v2478_v20, %v2806_v35 }
  0x76   :  { %1981 = vmatpush.msk.msra.mxu0 %vm196_vm6, %v2250_v11  ;;  %1996 = vmatpush.msk.msra.mxu1 %vm213_vm7, %v2250_v11  ;;  %vm132_vm6 = vcmp.eq.s32.totalorder %v2508_v22, %v2783_v32  ;;  %vm149_vm7 = vcmp.eq.s32.totalorder %v2493_v21, %v2797_v34 }
  0x77   :  { %2013 = vmatpush.msk.msra.mxu2 %vm198_vm8, %v2250_v11  ;;  %2028 = vmatpush.msk.msra.mxu3 %vm215_vm9, %v2250_v11  ;;  %vm134_vm8 = vcmp.eq.s32.totalorder %v2508_v22, %v2786_v33  ;;  %vm151_vm9 = vcmp.eq.s32.totalorder %v2493_v21, %v2806_v35 }
  0x78   :  { %1982 = vmatpush.msk.msra.mxu0 %vm180_vm10, %v2250_v11  ;;  %1997 = vmatpush.msk.msra.mxu1 %vm197_vm11, %v2250_v11  ;;  %vm116_vm10 = vcmp.eq.s32.totalorder %v2302_v1, %v2783_v32  ;;  %vm133_vm11 = vcmp.eq.s32.totalorder %v2508_v22, %v2797_v34 }
  0x79   :  { %2014 = vmatpush.msk.msra.mxu2 %vm182_vm12, %v2250_v11  ;;  %2029 = vmatpush.msk.msra.mxu3 %vm199_vm13, %v2250_v11  ;;  %vm118_vm12 = vcmp.eq.s32.totalorder %v2302_v1, %v2786_v33  ;;  %vm135_vm13 = vcmp.eq.s32.totalorder %v2508_v22, %v2806_v35 }
  0x7a   :  { %1021 = vmatmul.f32.gmra.mxu0 %v2734_v30  ;;  %1079 = vmatmul.f32.gmra.mxu2 %v2734_v30 }
  0x7b   :  { %1983 = vmatpush.msk.msra.mxu0 %vm164_vm14, %v2250_v11  ;;  %1998 = vmatpush.msk.msra.mxu1 %vm181_vm15, %v2250_v11  ;;  %vm117_vm14 = vcmp.eq.s32.totalorder %v2302_v1, %v2797_v34  ;;  %vm119_vm15 = vcmp.eq.s32.totalorder %v2302_v1, %v2806_v35 }
  0x7c   :  { %2015 = vmatpush.msk.msra.mxu2 %vm166_vm0, %v2250_v11  ;;  %2030 = vmatpush.msk.msra.mxu3 %vm183_vm1, %v2250_v11  ;;  %vm360_vm0 = vcmp.eq.s32.totalorder %v2305_v2, %v3003_v36  ;;  %vm362_vm1 = vcmp.eq.s32.totalorder %v2305_v2, %v3006_v37 }
  0x7d   :  { %1050 = vmatmul.f32.gmra.mxu1 %v2734_v30  ;;  %1108 = vmatmul.f32.gmra.mxu3 %v2734_v30 }
  0x7e   :  { %1984 = vmatpush.msk.msra.mxu0 %vm148_vm2, %v2250_v11  ;;  %1999 = vmatpush.msk.msra.mxu1 %vm165_vm3, %v2250_v11  ;;  %vm344_vm2 = vcmp.eq.s32.totalorder %v2308_v3, %v3003_v36  ;;  %vm346_vm3 = vcmp.eq.s32.totalorder %v2308_v3, %v3006_v37 }
  0x7f   :  { %2016 = vmatpush.msk.msra.mxu2 %vm150_vm4, %v2250_v11  ;;  %2031 = vmatpush.msk.msra.mxu3 %vm167_vm5, %v2250_v11  ;;  %vm363_vm4 = vcmp.eq.s32.totalorder %v2305_v2, %v3023_v38  ;;  %vm361_vm5 = vcmp.eq.s32.totalorder %v2305_v2, %v3026_v39 }
  0x80   :  { %1985 = vmatpush.msk.msra.mxu0 %vm132_vm6, %v2250_v11  ;;  %2000 = vmatpush.msk.msra.mxu1 %vm149_vm7, %v2250_v11  ;;  %vm328_vm6 = vcmp.eq.s32.totalorder %v2313_v5, %v3003_v36  ;;  %vm330_vm7 = vcmp.eq.s32.totalorder %v2313_v5, %v3006_v37 }
  0x81   :  { %2017 = vmatpush.msk.msra.mxu2 %vm134_vm8, %v2250_v11  ;;  %2032 = vmatpush.msk.msra.mxu3 %vm151_vm9, %v2250_v11  ;;  %vm347_vm8 = vcmp.eq.s32.totalorder %v2308_v3, %v3023_v38  ;;  %vm345_vm9 = vcmp.eq.s32.totalorder %v2308_v3, %v3026_v39 }
  0x82   :  { %1986 = vmatpush.msk.msra.mxu0 %vm116_vm10, %v2250_v11  ;;  %2001 = vmatpush.msk.msra.mxu1 %vm133_vm11, %v2250_v11  ;;  %vm312_vm10 = vcmp.eq.s32.totalorder %v2328_v10, %v3003_v36  ;;  %vm314_vm11 = vcmp.eq.s32.totalorder %v2328_v10, %v3006_v37 }
  0x83   :  { %2018 = vmatpush.msk.msra.mxu2 %vm118_vm12, %v2250_v11  ;;  %2033 = vmatpush.msk.msra.mxu3 %vm135_vm13, %v2250_v11  ;;  %vm331_vm12 = vcmp.eq.s32.totalorder %v2313_v5, %v3023_v38  ;;  %vm296_vm13 = vcmp.eq.s32.totalorder %v2355_v12, %v3003_v36 }
  0x84   :  { %1128 = vmatmul.f32.vlgmr.msra.gmra.mxu0 %v2557_v25  ;;  %1186 = vmatmul.f32.vlgmr.msra.gmra.mxu2 %v2557_v25 }
  0x85   :  { %2002 = vmatpush.msk.msra.mxu1 %vm117_vm14, %v2250_v11  ;;  %2034 = vmatpush.msk.msra.mxu3 %vm119_vm15, %v2250_v11  ;;  %vm298_vm14 = vcmp.eq.s32.totalorder %v2355_v12, %v3006_v37  ;;  %vm315_vm15 = vcmp.eq.s32.totalorder %v2328_v10, %v3023_v38 }
  0x86   :  { %2035 = vmatpush.msk.msrb.mxu0 %vm360_vm0, %v2250_v11  ;;  %2067 = vmatpush.msk.msrb.mxu2 %vm362_vm1, %v2250_v11  ;;  %vm280_vm0 = vcmp.eq.s32.totalorder %v2370_v13, %v3003_v36  ;;  %vm282_vm1 = vcmp.eq.s32.totalorder %v2370_v13, %v3006_v37 }
  0x87   :  { %1157 = vmatmul.f32.vlgmr.msra.gmra.mxu1 %v2557_v25  ;;  %1215 = vmatmul.f32.vlgmr.msra.gmra.mxu3 %v2557_v25 }
  0x88   :  { %2036 = vmatpush.msk.msrb.mxu0 %vm344_vm2, %v2250_v11  ;;  %2068 = vmatpush.msk.msrb.mxu2 %vm346_vm3, %v2250_v11  ;;  %vm299_vm2 = vcmp.eq.s32.totalorder %v2355_v12, %v3023_v38  ;;  %vm329_vm3 = vcmp.eq.s32.totalorder %v2313_v5, %v3026_v39 }
  0x89   :  { %2083 = vmatpush.msk.msrb.mxu3 %vm363_vm4, %v2250_v11  ;;  %2109 = vmatpush.msk.msrb.mxu1 %vm361_vm5, %v2250_v11  ;;  %vm264_vm4 = vcmp.eq.s32.totalorder %v2388_v14, %v3003_v36 }
  0x8a   :  { %2037 = vmatpush.msk.msrb.mxu0 %vm328_vm6, %v2250_v11  ;;  %2069 = vmatpush.msk.msrb.mxu2 %vm330_vm7, %v2250_v11  ;;  %vm266_vm6 = vcmp.eq.s32.totalorder %v2388_v14, %v3006_v37  ;;  %vm283_vm7 = vcmp.eq.s32.totalorder %v2370_v13, %v3023_v38 }
  0x8b   :  { %2084 = vmatpush.msk.msrb.mxu3 %vm347_vm8, %v2250_v11  ;;  %2110 = vmatpush.msk.msrb.mxu1 %vm345_vm9, %v2250_v11  ;;  %vm313_vm8 = vcmp.eq.s32.totalorder %v2328_v10, %v3026_v39 }
  0x8c   :  { %2038 = vmatpush.msk.msrb.mxu0 %vm312_vm10, %v2250_v11  ;;  %2070 = vmatpush.msk.msrb.mxu2 %vm314_vm11, %v2250_v11  ;;  %vm248_vm10 = vcmp.eq.s32.totalorder %v2403_v15, %v3003_v36  ;;  %vm250_vm11 = vcmp.eq.s32.totalorder %v2403_v15, %v3006_v37 }
  0x8d   :  { %2085 = vmatpush.msk.msrb.mxu3 %vm331_vm12, %v2250_v11  ;;  %1131 = vmatmul.f32.gmra.mxu0 %v2620_v28  ;;  %vm267_vm12 = vcmp.eq.s32.totalorder %v2388_v14, %v3023_v38 }
  0x8e   :  { %1189 = vmatmul.f32.gmra.mxu2 %v2620_v28  ;;  %2039 = vmatpush.msk.msrb.mxu0 %vm296_vm13, %v2250_v11  ;;  %vm232_vm13 = vcmp.eq.s32.totalorder %v2418_v16, %v3003_v36 }
  0x8f   :  { %2071 = vmatpush.msk.msrb.mxu2 %vm298_vm14, %v2250_v11  ;;  %2086 = vmatpush.msk.msrb.mxu3 %vm315_vm15, %v2250_v11  ;;  %vm234_vm14 = vcmp.eq.s32.totalorder %v2418_v16, %v3006_v37  ;;  %vm251_vm15 = vcmp.eq.s32.totalorder %v2403_v15, %v3023_v38 }
  0x90   :  { %1160 = vmatmul.f32.gmra.mxu1 %v2620_v28  ;;  %1218 = vmatmul.f32.gmra.mxu3 %v2620_v28 }
  0x91   :  { %2040 = vmatpush.msk.msrb.mxu0 %vm280_vm0, %v2250_v11  ;;  %2072 = vmatpush.msk.msrb.mxu2 %vm282_vm1, %v2250_v11  ;;  %vm216_vm0 = vcmp.eq.s32.totalorder %v2433_v17, %v3003_v36  ;;  %vm297_vm1 = vcmp.eq.s32.totalorder %v2355_v12, %v3026_v39 }
  0x92   :  { %2087 = vmatpush.msk.msrb.mxu3 %vm299_vm2, %v2250_v11  ;;  %2111 = vmatpush.msk.msrb.mxu1 %vm329_vm3, %v2250_v11  ;;  %vm218_vm2 = vcmp.eq.s32.totalorder %v2433_v17, %v3006_v37 }
  0x93   :  { %2041 = vmatpush.msk.msrb.mxu0 %vm264_vm4, %v2250_v11  ;;  %2073 = vmatpush.msk.msrb.mxu2 %vm266_vm6, %v2250_v11  ;;  %vm235_vm4 = vcmp.eq.s32.totalorder %v2418_v16, %v3023_v38  ;;  %vm200_vm6 = vcmp.eq.s32.totalorder %v2448_v18, %v3003_v36 }
  0x94   :  { %2088 = vmatpush.msk.msrb.mxu3 %vm283_vm7, %v2250_v11  ;;  %2112 = vmatpush.msk.msrb.mxu1 %vm313_vm8, %v2250_v11  ;;  %vm281_vm7 = vcmp.eq.s32.totalorder %v2370_v13, %v3026_v39 }
  0x95   :  { %2042 = vmatpush.msk.msrb.mxu0 %vm248_vm10, %v2250_v11  ;;  %2074 = vmatpush.msk.msrb.mxu2 %vm250_vm11, %v2250_v11  ;;  %vm202_vm10 = vcmp.eq.s32.totalorder %v2448_v18, %v3006_v37  ;;  %vm219_vm11 = vcmp.eq.s32.totalorder %v2433_v17, %v3023_v38 }
  0x96   :  { %2089 = vmatpush.msk.msrb.mxu3 %vm267_vm12, %v2250_v11  ;;  %1134 = vmatmul.f32.gmra.mxu0 %v2677_v29  ;;  %vm184_vm12 = vcmp.eq.s32.totalorder %v2463_v19, %v3003_v36 }
  0x97   :  { %1192 = vmatmul.f32.gmra.mxu2 %v2677_v29  ;;  %2043 = vmatpush.msk.msrb.mxu0 %vm232_vm13, %v2250_v11  ;;  %vm265_vm13 = vcmp.eq.s32.totalorder %v2388_v14, %v3026_v39 }
  0x98   :  { %2075 = vmatpush.msk.msrb.mxu2 %vm234_vm14, %v2250_v11  ;;  %2090 = vmatpush.msk.msrb.mxu3 %vm251_vm15, %v2250_v11  ;;  %vm186_vm14 = vcmp.eq.s32.totalorder %v2463_v19, %v3006_v37  ;;  %vm203_vm15 = vcmp.eq.s32.totalorder %v2448_v18, %v3023_v38 }
  0x99   :  { %1163 = vmatmul.f32.gmra.mxu1 %v2677_v29  ;;  %1221 = vmatmul.f32.gmra.mxu3 %v2677_v29 }
  0x9a   :  { %2044 = vmatpush.msk.msrb.mxu0 %vm216_vm0, %v2250_v11  ;;  %2113 = vmatpush.msk.msrb.mxu1 %vm297_vm1, %v2250_v11  ;;  %vm168_vm0 = vcmp.eq.s32.totalorder %v2478_v20, %v3003_v36 }
  0x9b   :  { %2076 = vmatpush.msk.msrb.mxu2 %vm218_vm2, %v2250_v11  ;;  %2091 = vmatpush.msk.msrb.mxu3 %vm235_vm4, %v2250_v11  ;;  %vm3412_vm2 = vcmp.eq.s32.totalorder %v2403_v15, %v3026_v39  ;;  %vm170_vm4 = vcmp.eq.s32.totalorder %v2478_v20, %v3006_v37 }
  0x9c   :  { %2045 = vmatpush.msk.msrb.mxu0 %vm200_vm6, %v2250_v11  ;;  %2114 = vmatpush.msk.msrb.mxu1 %vm281_vm7, %v2250_v11  ;;  %vm187_vm6 = vcmp.eq.s32.totalorder %v2463_v19, %v3023_v38 }
  0x9d   :  { %2077 = vmatpush.msk.msrb.mxu2 %vm202_vm10, %v2250_v11  ;;  %2092 = vmatpush.msk.msrb.mxu3 %vm219_vm11, %v2250_v11  ;;  %vm152_vm10 = vcmp.eq.s32.totalorder %v2493_v21, %v3003_v36  ;;  %vm3413_vm11 = vcmp.eq.s32.totalorder %v2418_v16, %v3026_v39 }
  0x9e   :  { %2046 = vmatpush.msk.msrb.mxu0 %vm184_vm12, %v2250_v11  ;;  %2115 = vmatpush.msk.msrb.mxu1 %vm265_vm13, %v2250_v11  ;;  %vm154_vm12 = vcmp.eq.s32.totalorder %v2493_v21, %v3006_v37 }
  0x9f   :  { %2078 = vmatpush.msk.msrb.mxu2 %vm186_vm14, %v2250_v11  ;;  %2093 = vmatpush.msk.msrb.mxu3 %vm203_vm15, %v2250_v11  ;;  %vm171_vm14 = vcmp.eq.s32.totalorder %v2478_v20, %v3023_v38  ;;  %vm136_vm15 = vcmp.eq.s32.totalorder %v2508_v22, %v3003_v36 }
  0xa0   :  { %1137 = vmatmul.f32.gmra.mxu0 %v2734_v30  ;;  %1195 = vmatmul.f32.gmra.mxu2 %v2734_v30 }
  0xa1   :  { %2047 = vmatpush.msk.msrb.mxu0 %vm168_vm0, %v2250_v11  ;;  %2116 = vmatpush.msk.msrb.mxu1 %vm3412_vm2, %v2250_v11  ;;  %vm217_vm0 = vcmp.eq.s32.totalorder %v2433_v17, %v3026_v39  ;;  %vm120_vm2 = vcmp.eq.s32.totalorder %v2302_v1, %v3003_v36 }
  0xa2   :  { %2079 = vmatpush.msk.msrb.mxu2 %vm170_vm4, %v2250_v11  ;;  %2094 = vmatpush.msk.msrb.mxu3 %vm187_vm6, %v2250_v11  ;;  %vm138_vm4 = vcmp.eq.s32.totalorder %v2508_v22, %v3006_v37  ;;  %vm155_vm6 = vcmp.eq.s32.totalorder %v2493_v21, %v3023_v38 }
  0xa3   :  { %1166 = vmatmul.f32.gmra.mxu1 %v2734_v30  ;;  %1224 = vmatmul.f32.gmra.mxu3 %v2734_v30 }
  0xa4   :  { %2048 = vmatpush.msk.msrb.mxu0 %vm152_vm10, %v2250_v11  ;;  %2117 = vmatpush.msk.msrb.mxu1 %vm3413_vm11, %v2250_v11  ;;  %vm201_vm10 = vcmp.eq.s32.totalorder %v2448_v18, %v3026_v39  ;;  %vm122_vm11 = vcmp.eq.s32.totalorder %v2302_v1, %v3006_v37 }
  0xa5   :  { %2080 = vmatpush.msk.msrb.mxu2 %vm154_vm12, %v2250_v11  ;;  %2095 = vmatpush.msk.msrb.mxu3 %vm171_vm14, %v2250_v11  ;;  %vm139_vm12 = vcmp.eq.s32.totalorder %v2508_v22, %v3023_v38  ;;  %vm185_vm14 = vcmp.eq.s32.totalorder %v2463_v19, %v3026_v39 }
  0xa6   :  { %2049 = vmatpush.msk.msrb.mxu0 %vm136_vm15, %v2250_v11  ;;  %2118 = vmatpush.msk.msrb.mxu1 %vm217_vm0, %v2250_v11  ;;  %vm123_vm15 = vcmp.eq.s32.totalorder %v2302_v1, %v3023_v38 }
  0xa7   :  { %2081 = vmatpush.msk.msrb.mxu2 %vm138_vm4, %v2250_v11  ;;  %2096 = vmatpush.msk.msrb.mxu3 %vm155_vm6, %v2250_v11 }
  0xa8   :  { %2050 = vmatpush.msk.msrb.mxu0 %vm120_vm2, %v2250_v11  ;;  %2119 = vmatpush.msk.msrb.mxu1 %vm201_vm10, %v2250_v11  ;;  %vm169_vm2 = vcmp.eq.s32.totalorder %v2478_v20, %v3026_v39 }
  0xa9   :  { %2082 = vmatpush.msk.msrb.mxu2 %vm122_vm11, %v2250_v11  ;;  %2097 = vmatpush.msk.msrb.mxu3 %vm139_vm12, %v2250_v11  ;;  %vm137_vm11 = vcmp.eq.s32.totalorder %v2508_v22, %v3026_v39 }
  0xaa   :  { %1244 = vmatmul.f32.vlgmr.msrb.gmra.mxu0 %v2557_v25  ;;  %1302 = vmatmul.f32.vlgmr.msrb.gmra.mxu2 %v2557_v25 }
  0xab   :  { %2051 = vmatpush.msk.msra.mxu0 %vm361_vm5, %v2250_v11  ;;  %2120 = vmatpush.msk.msrb.mxu1 %vm185_vm14, %v2250_v11  ;;  %vm153_vm5 = vcmp.eq.s32.totalorder %v2493_v21, %v3026_v39 }
  0xac   :  { %2098 = vmatpush.msk.msrb.mxu3 %vm123_vm15, %v2250_v11 }
  0xad   :  { %1331 = vmatmul.f32.vlgmr.msrb.gmra.mxu3 %v2557_v25  ;;  %2052 = vmatpush.msk.msra.mxu0 %vm345_vm9, %v2250_v11  ;;  %vm121_vm9 = vcmp.eq.s32.totalorder %v2302_v1, %v3026_v39 }
  0xae   :  { %2121 = vmatpush.msk.msrb.mxu1 %vm169_vm2, %v2250_v11 }
  0xaf   :  { %2053 = vmatpush.msk.msra.mxu0 %vm329_vm3, %v2250_v11  ;;  %vm3414_vm3 = vcmp.eq.s32.totalorder %v2403_v15, %v3026_v39 }
  0xb0   :  { %2122 = vmatpush.msk.msrb.mxu1 %vm153_vm5, %v2250_v11 }
  0xb1   :  { %2054 = vmatpush.msk.msra.mxu0 %vm313_vm8, %v2250_v11  ;;  %v3299_v40 = vpop.f32.mrf.mxu0  ;;  %vm3415_vm8 = vcmp.eq.s32.totalorder %v2418_v16, %v3026_v39 }
  0xb2   :  { %2123 = vmatpush.msk.msrb.mxu1 %vm137_vm11, %v2250_v11  ;;  %1247 = vmatmul.f32.gmra.mxu0 %v2620_v28 }
  0xb3   :  { %1305 = vmatmul.f32.gmra.mxu2 %v2620_v28  ;;  %2055 = vmatpush.msk.msra.mxu0 %vm297_vm1, %v2250_v11  ;;  %vm1408_vm1 = vcmask 261120  }
  0xb4   :  { %2124 = vmatpush.msk.msrb.mxu1 %vm121_vm9, %v2250_v11  ;;  %v926_v41 = vpop.f32.mrf.mxu1 }
  0xb5   :  { %1276 = vmatmul.f32.vlgmr.msrb.gmra.mxu1 %v2620_v28  ;;  %1334 = vmatmul.f32.gmra.mxu3 %v2620_v28  ;;  %v1344_v8 = vmax.f32 %v3299_v40, %v926_v41 }
  0xb6   :  { %2056 = vmatpush.msk.msra.mxu0 %vm281_vm7, %v2250_v11 }
  0xb7   :  { %v955_v42 = vpop.f32.mrf.mxu2 }
  0xb8   :  { %2057 = vmatpush.msk.msra.mxu0 %vm265_vm13, %v2250_v11  ;;  %v1348_v12 = vmax.f32 %v1344_v8, %v955_v42  ;;  %v1402_v8 = vld [vmem:[#allocation6 + $0x10] sm:$0xff] }
  0xba   :  { %2058 = vmatpush.msk.msra.mxu0 %vm3414_vm3, %v2250_v11  ;;  %v984_v43 = vpop.f32.mrf.mxu3 }
  0xbb   :  { %1250 = vmatmul.f32.gmra.mxu0 %v2677_v29  ;;  %1308 = vmatmul.f32.gmra.mxu2 %v2677_v29  ;;  %v900_v44 = vpop.f32.mrf.mxu0  ;;  %v1352_v19 = vmax.f32 %v1348_v12, %v984_v43 }
  0xbc   :  { %2059 = vmatpush.msk.msra.mxu0 %vm3415_vm8, %v2250_v11 }
  0xbd   :  { %1279 = vmatmul.f32.gmra.mxu1 %v2677_v29  ;;  %1337 = vmatmul.f32.gmra.mxu3 %v2677_v29 }
  0xbe   :  { %2060 = vmatpush.msk.msra.mxu0 %vm217_vm0, %v2250_v11  ;;  %v929_v45 = vpop.f32.mrf.mxu1 }
  0xbf   :  { %v1345_v5 = vmax.f32 %v900_v44, %v929_v45 }
  0xc0   :  { %2061 = vmatpush.msk.msra.mxu0 %vm201_vm10, %v2250_v11 }
  0xc1   :  { %v958_v46 = vpop.f32.mrf.mxu2 }
  0xc2   :  { %2062 = vmatpush.msk.msra.mxu0 %vm185_vm14, %v2250_v11  ;;  %v1349_v9 = vmax.f32 %v1345_v5, %v958_v46 }
  0xc3   :  { %1253 = vmatmul.f32.gmra.mxu0 %v2734_v30  ;;  %1311 = vmatmul.f32.gmra.mxu2 %v2734_v30 }
  0xc4   :  { %2063 = vmatpush.msk.msra.mxu0 %vm169_vm2, %v2250_v11  ;;  %v987_v47 = vpop.f32.mrf.mxu3 }
  0xc5   :  { %1282 = vmatmul.f32.gmra.mxu1 %v2734_v30  ;;  %1340 = vmatmul.f32.gmra.mxu3 %v2734_v30  ;;  %v903_v48 = vpop.f32.mrf.mxu0  ;;  %v1353_v16 = vmax.f32 %v1349_v9, %v987_v47 }
  0xc6   :  { %2064 = vmatpush.msk.msra.mxu0 %vm153_vm5, %v2250_v11 }
  0xc8   :  { %2065 = vmatpush.msk.msra.mxu0 %vm137_vm11, %v2250_v11  ;;  %v932_v49 = vpop.f32.mrf.mxu1 }
  0xc9   :  { %v1346_v3 = vmax.f32 %v903_v48, %v932_v49 }
  0xca   :  { %2066 = vmatpush.msk.msra.mxu0 %vm121_vm9, %v2250_v11 }
  0xcb   :  { %1273 = vmatmul.f32.vlgmr.msra.gmra.mxu0 %v2557_v25  ;;  %v961_v50 = vpop.f32.mrf.mxu2 }
  0xcc   :  { %v1350_v6 = vmax.f32 %v1346_v3, %v961_v50  ;;  %v1491_v3 = vld [vmem:[%s3408_s4] sm:$0xff] }
  0xce   :  { %v990_v51 = vpop.f32.mrf.mxu3 }
  0xcf   :  { %v906_v52 = vpop.f32.mrf.mxu0  ;;  %v1354_v13 = vmax.f32 %v1350_v6, %v990_v51 }
  0xd2   :  { %v935_v53 = vpop.f32.mrf.mxu1 }
  0xd3   :  { %v1347_v2 = vmax.f32 %v906_v52, %v935_v53 }
  0xd5   :  { %v964_v54 = vpop.f32.mrf.mxu2 }
  0xd6   :  { %v1351_v4 = vmax.f32 %v1347_v2, %v964_v54 }
  0xd8   :  { %v993_v55 = vpop.f32.mrf.mxu3 }
  0xd9   :  { %v1013_v56 = vpop.f32.mrf.mxu0  ;;  %v1355_v10 = vmax.f32 %v1351_v4, %v993_v55  ;;  %v1400_v55 = vld [vmem:[#allocation6] sm:$0xff] }
  0xda   :  { %v1356_v22 = vmax.f32 %v1352_v19, %v1013_v56 }
  0xdc   :  { %v1042_v57 = vpop.f32.mrf.mxu1 }
  0xdd   :  { %v1360_v29 = vmax.f32 %v1356_v22, %v1042_v57 }
  0xdf   :  { %v1071_v58 = vpop.f32.mrf.mxu2 }
  0xe0   :  { %v1364_v33 = vmax.f32 %v1360_v29, %v1071_v58  ;;  %v1492_v58 = vld [vmem:[%s3408_s4 + $0x8] sm:$0xff] }
  0xe2   :  { %v1100_v59 = vpop.f32.mrf.mxu3 }
  0xe3   :  { %v1016_v60 = vpop.f32.mrf.mxu0  ;;  %v1368_v36 = vmax.f32 %v1364_v33, %v1100_v59  ;;  %v2251_v59 = vmov 0  }
  0xe4   :  { %v1357_v20 = vmax.f32 %v1353_v16, %v1016_v60  ;;  %2138 = vset.pattern.permute.xlu1 %v2251_v59  ;;  %2137 = vset.pattern.permute.xlu0 %v2251_v59  ;;  %v1401_v60 = vld [vmem:[#allocation6 + $0x8] sm:$0xff] }
  0xe5   :  { %1502 = vperm.xlu1 %2138, %v1492_v58  }
  0xe6   :  { %v1045_v61 = vpop.f32.mrf.mxu1 }
  0xe7   :  { %v1361_v26 = vmax.f32 %v1357_v20, %v1045_v61  ;;  %v1494_v20 = vld [vmem:[%s3408_s4 + $0x18] sm:$0xff] }
  0xe8   :  { %1512 = vperm.xlu0 %2137, %v1494_v20  }
  0xe9   :  { %v1074_v62 = vpop.f32.mrf.mxu2 }
  0xea   :  { %v1365_v30 = vmax.f32 %v1361_v26, %v1074_v62 }
  0xec   :  { %v1103_v63 = vpop.f32.mrf.mxu3 }
  0xed   :  { %v1019_v0 = vpop.f32.mrf.mxu0  ;;  %v1369_v35 = vmax.f32 %v1365_v30, %v1103_v63  ;;  %1497 = vperm.xlu1 %2138, %v1491_v3  }
  0xee   :  { %v1358_v17 = vmax.f32 %v1354_v13, %v1019_v0 }
  0xf0   :  { %v1048_v1 = vpop.f32.mrf.mxu1 }
  0xf1   :  { %v1362_v23 = vmax.f32 %v1358_v17, %v1048_v1 }
  0xf3   :  { %v1077_v7 = vpop.f32.mrf.mxu2 }
  0xf4   :  { %v1366_v27 = vmax.f32 %v1362_v23, %v1077_v7 }
  0xf6   :  { %v1106_v11 = vpop.f32.mrf.mxu3 }
  0xf7   :  { %v1022_v14 = vpop.f32.mrf.mxu0  ;;  %v1370_v34 = vmax.f32 %v1366_v27, %v1106_v11 }
  0xf8   :  { %v1359_v15 = vmax.f32 %v1355_v10, %v1022_v14 }
  0xfa   :  { %v1051_v18 = vpop.f32.mrf.mxu1 }
  0xfb   :  { %v1363_v21 = vmax.f32 %v1359_v15, %v1051_v18 }
  0xfd   :  { %v1080_v24 = vpop.f32.mrf.mxu2 }
  0xfe   :  { %v1367_v25 = vmax.f32 %v1363_v21, %v1080_v24 }
 0x100   :  { %v1109_v28 = vpop.f32.mrf.mxu3 }
 0x101   :  { %v1371_v31 = vmax.f32 %v1367_v25, %v1109_v28  ;;  %v1129_v32 = vpop.f32.mrf.mxu0  ;;  %v1403_v25 = vld [vmem:[#allocation6 + $0x18] sm:$0xff] }
 0x103   :  { %1474 = vmatpush.msra.mxu1 %v1371_v31 }
 0x104   :  { %v1158_v40 = vpop.f32.mrf.mxu1 }
 0x105   :  { %1475 = vmatpush.msra.mxu1 %v1370_v34  ;;  %v1372_v10 = vmax.f32 %v1129_v32, %v1158_v40 }
 0x107   :  { %v1187_v37 = vpop.f32.mrf.mxu2  ;;  %1476 = vmatpush.msra.mxu1 %v1369_v35 }
 0x108   :  { %v1376_v15 = vmax.f32 %v1372_v10, %v1187_v37 }
 0x109   :  { %1477 = vmatpush.msra.mxu1 %v1368_v36  ;;  %v1493_v36 = vld [vmem:[%s3408_s4 + $0x10] sm:$0xff] }
 0x10a   :  { %v1132_v38 = vpop.f32.mrf.mxu0  ;;  %v1216_v39 = vpop.f32.mrf.mxu3  ;;  %2103 = vmatmul.msk.f32.vlgmr.msra.gmra.mxu1 %vm1408_vm1, %v1400_v55  ;;  %1507 = vperm.xlu0 %2137, %v1493_v36  }
 0x10b   :  { %v1380_v22 = vmax.f32 %v1376_v15, %v1216_v39 }
 0x10d   :  { %v1161_v44 = vpop.f32.mrf.mxu1 }
 0x10e   :  { %v1373_v4 = vmax.f32 %v1132_v38, %v1161_v44  ;;  %v1407_v44 = vld [vmem:[#allocation8 + $0x18] sm:$0xff] }
 0x111   :  { %v1190_v41 = vpop.f32.mrf.mxu2 }
 0x112   :  { %2104 = vmatmul.msk.f32.gmra.mxu1 %vm1408_vm1, %v1401_v60  ;;  %v1377_v7 = vmax.f32 %v1373_v4, %v1190_v41  ;;  %v1404_v41 = vld [vmem:[#allocation8] sm:$0xff] }
 0x113   :  { %v1135_v42 = vpop.f32.mrf.mxu0  ;;  %v1219_v43 = vpop.f32.mrf.mxu3 }
 0x114   :  { %v1381_v16 = vmax.f32 %v1377_v7, %v1219_v43  ;;  %v1406_v43 = vld [vmem:[#allocation8 + $0x10] sm:$0xff] }
 0x116   :  { %v1164_v48 = vpop.f32.mrf.mxu1 }
 0x117   :  { %v1374_v0 = vmax.f32 %v1135_v42, %v1164_v48  ;;  %v1405_v42 = vld [vmem:[#allocation8 + $0x8] sm:$0xff] }
 0x11a   :  { %v1193_v45 = vpop.f32.mrf.mxu2  ;;  %2105 = vmatmul.msk.f32.gmra.mxu1 %vm1408_vm1, %v1402_v8 }
 0x11b   :  { %v1378_v5 = vmax.f32 %v1374_v0, %v1193_v45 }
 0x11c   :  { %v1222_v46 = vpop.f32.mrf.mxu3 }
 0x11d   :  { %v1138_v47 = vpop.f32.mrf.mxu0  ;;  %v1382_v11 = vmax.f32 %v1378_v5, %v1222_v46  ;;  %v1523_v5 = vld [vmem:[%s3409_s5] sm:$0x1]  ;;  %s2252_s5 = smov [#allocation9]  }
 0x11e   :  { %s1574_s10 = sshll.u32 %s2252_s5, 4  ;;  %s1575_s10 = int_to_ptr.vmem [resolvable:$true] %s1574_s10 }
 0x120   :  { %v1167_v52 = vpop.f32.mrf.mxu1 }
 0x121   :  { %v1375_v2 = vmax.f32 %v1138_v47, %v1167_v52 }
 0x122   :  { %2106 = vmatmul.msk.f32.gmra.mxu1 %vm1408_vm1, %v1403_v25 }
 0x123   :  { %v1196_v49 = vpop.f32.mrf.mxu2 }
 0x124   :  { %v1379_v6 = vmax.f32 %v1375_v2, %v1196_v49 }
 0x126   :  { %v1225_v50 = vpop.f32.mrf.mxu3 }
 0x127   :  { %v1245_v51 = vpop.f32.mrf.mxu0  ;;  %v1383_v12 = vmax.f32 %v1379_v6, %v1225_v50  ;;  %v1525_v6 = vstv %s3410_s6  ;;  %s1576_s6 = sshll.u32 %s3411_s7, 4  ;;  %s1577_s6 = int_to_ptr.hbm [resolvable:$true] %s1576_s6 }
 0x128   :  { %v1384_v27 = vmax.f32 %v1380_v22, %v1245_v51 }
 0x12d   :  { %v1303_v53 = vpop.f32.mrf.mxu2 }
 0x12f   :  { %v1248_v54 = vpop.f32.mrf.mxu0 }
 0x130   :  { %v3371_v56 = vpop.f32.mrf.mxu3  ;;  %v1385_v21 = vmax.f32 %v1381_v16, %v1248_v54 }
 0x132   :  { %v1277_v57 = vpop.f32.mrf.mxu1 }
 0x133   :  { %v1389_v28 = vmax.f32 %v1385_v21, %v1277_v57 }
 0x136   :  { %v1306_v61 = vpop.f32.mrf.mxu2 }
 0x137   :  { %v1393_v33 = vmax.f32 %v1389_v28, %v1306_v61 }
 0x138   :  { %v1251_v62 = vpop.f32.mrf.mxu0  ;;  %v1335_v63 = vpop.f32.mrf.mxu3 }
 0x139   :  { %v1386_v17 = vmax.f32 %v1382_v11, %v1251_v62  ;;  %v1397_v39 = vmax.f32 %v1393_v33, %v1335_v63 }
 0x13a   :  { %v1280_v1 = vpop.f32.mrf.mxu1 }
 0x13b   :  { %v1390_v23 = vmax.f32 %v1386_v17, %v1280_v1 }
 0x13e   :  { %v1309_v9 = vpop.f32.mrf.mxu2 }
 0x13f   :  { %v1394_v29 = vmax.f32 %v1390_v23, %v1309_v9 }
 0x140   :  { %v1254_v13 = vpop.f32.mrf.mxu0  ;;  %v1338_v14 = vpop.f32.mrf.mxu3 }
 0x141   :  { %v1387_v18 = vmax.f32 %v1383_v12, %v1254_v13  ;;  %v1398_v37 = vmax.f32 %v1394_v29, %v1338_v14 }
 0x142   :  { %v1283_v19 = vpop.f32.mrf.mxu1 }
 0x143   :  { %v1391_v24 = vmax.f32 %v1387_v18, %v1283_v19 }
 0x146   :  { %v1312_v26 = vpop.f32.mrf.mxu2 }
 0x147   :  { %v1395_v30 = vmax.f32 %v1391_v24, %v1312_v26 }
 0x148   :  { %v1274_v31 = vpop.f32.mrf.mxu0  ;;  %v1341_v32 = vpop.f32.mrf.mxu3 }
 0x149   :  { %v1388_v34 = vmax.f32 %v1384_v27, %v1274_v31  ;;  %v1399_v35 = vmax.f32 %v1395_v30, %v1341_v32 }
 0x14b   :  { %v1392_v38 = vmax.f32 %v1388_v34, %v1303_v53  ;;  %1433 = vmatpush.msrb.mxu0 %v1399_v35  ;;  %2125 = vmatpush.msra.mxu3 %v1399_v35 }
 0x14d   :  { %1434 = vmatpush.msrb.mxu0 %v1398_v37  ;;  %2126 = vmatpush.msra.mxu3 %v1398_v37  ;;  %v1396_v40 = vmax.f32 %v1392_v38, %v3371_v56 }
 0x14f   :  { %1435 = vmatpush.msrb.mxu0 %v1397_v39  ;;  %2127 = vmatpush.msra.mxu3 %v1397_v39 }
 0x151   :  { %1436 = vmatpush.msrb.mxu0 %v1396_v40  ;;  %2128 = vmatpush.msra.mxu3 %v1396_v40 }
 0x152   :  { %2099 = vmatmul.msk.f32.vlgmr.msrb.gmra.mxu0 %vm1408_vm1, %v1404_v41  ;;  %2100 = vmatmul.msk.f32.vlgmr.msra.gmra.mxu3 %vm1408_vm1, %v1405_v42 }
 0x157   :  { %v1503_v51 = vpop.permute.xlu1 %1502 }
 0x15a   :  { %2101 = vmatmul.msk.f32.gmra.mxu3 %vm1408_vm1, %v1406_v43  ;;  %v1513_v49 = vpop.permute.xlu0 %1512 }
 0x15f   :  { %v1498_v62 = vpop.permute.xlu1 %1497 }
 0x162   :  { %2102 = vmatmul.msk.f32.gmra.mxu3 %vm1408_vm1, %v1407_v44 }
 0x17c   :  { %v1508_v54 = vpop.permute.xlu0 %1507 }
 0x187   :  { %v1479_v45 = vpop.f32.mrf.mxu1 }
 0x18f   :  { %v1482_v46 = vpop.f32.mrf.mxu1 }
 0x197   :  { %v1485_v48 = vpop.f32.mrf.mxu1 }
 0x19f   :  { %v1488_v52 = vpop.f32.mrf.mxu1 }
 0x1cf   :  { %v1438_v55 = vpop.f32.mrf.mxu0 }
 0x1d0   :  { %v1480_v59 = vadd.f32 %v1479_v45, %v1438_v55 }
 0x1d2   :  { %v1515_v2 = vadd.f32 %v1498_v62, %v1480_v59 }
 0x1d4   :  { %v1519_v4 = vmax.f32 %v1515_v2, 0.0 }
 0x1d5   :  { %v1441_v47 = vpop.f32.mrf.mxu3 }
 0x1d6   :  { %v1483_v57 = vadd.f32 %v1482_v46, %v1441_v47 }
 0x1d8   :  { %v1516_v63 = vadd.f32 %v1503_v51, %v1483_v57 }
 0x1da   :  { %v1520_v3 = vmax.f32 %v1516_v63, 0.0 }
 0x1dd   :  { %v1444_v50 = vpop.f32.mrf.mxu3 }
 0x1de   :  { %v1486_v53 = vadd.f32 %v1485_v48, %v1444_v50 }
 0x1e0   :  { %v1517_v60 = vadd.f32 %v1508_v54, %v1486_v53 }
 0x1e2   :  { %v1521_v1 = vmax.f32 %v1517_v60, 0.0 }
 0x1e5   :  { %v1447_v56 = vpop.f32.mrf.mxu3 }
 0x1e6   :  { %v1489_v58 = vadd.f32 %v1488_v52, %v1447_v56 }
 0x1e8   :  { %v1518_v61 = vadd.f32 %v1513_v49, %v1489_v58 }
 0x1ea   :  { %v1522_v0 = vmax.f32 %v1518_v61, 0.0 }
 0x1ec   :  { %1541 = vmatpush.msra.mxu2 %v1522_v0 }
 0x1ee   :  { %1542 = vmatpush.msra.mxu2 %v1521_v1 }
 0x1f0   :  { %1543 = vmatpush.msra.mxu2 %v1520_v3 }
 0x1f2   :  { %1544 = vmatpush.msra.mxu2 %v1519_v4 }
 0x1f3   :  { %2107 = vmatmul.msk.f32.vlgmr.msra.gmra.mxu2 %vm1408_vm1, %v1523_v5 }
 0x276   :  { %v1546_v7 = vpop.f32.mrf.mxu2 }
 0x277   :  { %v1547_v8 = vadd.f32 %v1546_v7, %v1525_v6 }
 0x279   :  { %v2108_v9 = vmul.f32 -1.442695, %v1547_v8 }
 0x27b   :  { %2139 = vpow2.f32 %v2108_v9 }
 0x281   :  { %v2140_v10 = vpop.eup %2139 }
 0x282   :  { %v1552_v11 = vadd.f32 1.0, %v2140_v10 }
 0x284   :  { %2141 = vrcp.f32 %v1552_v11  ;;  %v1564_v15 = vand.u32 2147483648, %v1552_v11  ;;  %v1562_v17 = vand.u32 2147483647, %v1552_v11  ;;  %vm1558_vm13 = vweird.f32 %v1552_v11 }
 0x286   :  { %v1565_v19 = vor.u32 1.1754944e-38, %v1564_v15  ;;  %vm1563_vm4 = vcmp.eq.f32.partialorder %v1562_v17, 8.507059e+37 }
 0x28a   :  { %v2142_v12 = vpop.eup %2141 }
 0x28b   :  { %v1554_v13 = vmul.f32 %v2142_v12, %v1552_v11  ;;  %vm1559_vm7 = vweird.f32 %v2142_v12 }
 0x28c   :  { %vm1560_vm0 = vmor %vm1558_vm13, %vm1559_vm7 }
 0x28d   :  { %v1555_v14 = vsub.f32 1.0, %v1554_v13 }
 0x28f   :  { %v1556_v16 = vmul.f32 %v2142_v12, %v1555_v14 }
 0x291   :  { %v1557_v18 = vadd.f32 %v2142_v12, %v1556_v16 }
 0x293   :  { %v1561_v20 = vsel %vm1560_vm0, %v2142_v12, %v1557_v18 }
 0x294   :  { %v1566_v21 = vsel %vm1563_vm4, %v1565_v19, %v1561_v20 }
 0x295   :  { %1568 = vst [vmem:[#allocation9] sm:$0x1] %v1566_v21 }
 0x296   :  { %1579 = dma.vmem_to_hbm [thread:$0]  %s1575_s10, 16, %s1577_s6, [#allocation5]  }
 0x297   :  { %2243 = dma.done.wait [#allocation5], 16  }
 0x298   :  { %2244 = vsyncadd [#allocation5], 4294967280 }
 0x299   :  { %1584 = vsyncpa [#allocation4], 1 }
 0x29a   :  { %1585 = vsyncpa [#allocation7], 1 }
 0x29b   :  { %1586 = vsyncpa [#allocation5], 1 }

</bundles_post_ra>
